<compile_context>
chip_gen: v6e
topology: v6e:2x2x1
jax: 0.10.0
libtpu: 0.0.40
codegen_flags: <defaults>
</compile_context>

<pallas_src>
import functools

import jax
import jax.numpy as jnp
from jax.experimental import pallas as pl
from jax.experimental.pallas import tpu as pltpu


# ---------------------------------------------------------------------------
# Pallas kernel: fused Conv3x3(+BN fold)+ReLU + Conv1x1(+bias) on one row tile.
# ---------------------------------------------------------------------------
def _bisenet_output_kernel(x_ref, top_ref, bot_ref, w3_ref, bias_ref, w1_ref,
                           b1_ref, o_ref):
    """x:(1,TH,W,Cin) bf16; top/bot:(1,1,W,Cin) bf16 row-clamped halo rows;
    w3:(9*Cin,Cmid) bf16 (BN scale folded in); bias:(1,Cmid) f32;
    w1:(Cmid,Cout) bf16; b1:(1,Cout) f32; o:(1,TH,W,Cout) f32."""
    i = pl.program_id(1)
    n_row_tiles = pl.num_programs(1)

    _, TH, W, Cin = x_ref.shape
    Cmid = w3_ref.shape[-1]
    Cout = o_ref.shape[-1]
    M = TH * W
    Hs = TH + 2  # row tile plus top/bottom halo rows

    # ---- assemble the halo'd tile in bf16 (strict zero padding via where) --
    top_raw = top_ref[0, 0]                               # (W, Cin) bf16
    bot_raw = bot_ref[0, 0]
    top = jnp.where(i > 0, top_raw, jnp.zeros_like(top_raw))
    bot = jnp.where(i < n_row_tiles - 1, bot_raw, jnp.zeros_like(bot_raw))
    x = x_ref[0].reshape(M, Cin)                          # (TH*W, Cin) bf16
    xs = jnp.concatenate([top, x, bot], axis=0)           # (Hs*W, Cin) bf16

    # ---- column-border mask: one flag per flattened row, lane-broadcast ----
    row_idx = jax.lax.broadcasted_iota(jnp.int32, (Hs * W, 1), 0)
    col = (row_idx & (W - 1)) if (W & (W - 1)) == 0 else (row_idx % W)

    # ---- dx = -1 / +1 shifts: XLU roll (f32) + border mask, back to bf16 ---
    xs_f = xs.astype(jnp.float32)
    x_l = jnp.where(col == 0, 0.0,
                    pltpu.roll(xs_f, 1, axis=0)).astype(jnp.bfloat16)
    x_r = jnp.where(col == W - 1, 0.0,
                    pltpu.roll(xs_f, Hs * W - 1, axis=0)).astype(jnp.bfloat16)
    xcat = jnp.concatenate([x_l, xs, x_r], axis=1)        # (Hs*W, 3*Cin) bf16

    # ---- 3x3 conv as ONE wide-K matmul (K = 9*Cin), f32 accumulation -------
    xw = jnp.concatenate([xcat[0:M], xcat[W:W + M], xcat[2 * W:2 * W + M]],
                         axis=1)                          # (TH*W, 9*Cin) bf16
    acc = jnp.dot(xw, w3_ref[...], preferred_element_type=jnp.float32)

    # ---- folded-BN bias + ReLU (f32), then 1x1 conv + bias ------------------
    h = jnp.maximum(acc + bias_ref[...], 0.0)
    y = jnp.dot(h.astype(jnp.bfloat16), w1_ref[...],
                preferred_element_type=jnp.float32) + b1_ref[...]
    o_ref[0] = y.reshape(TH, W, Cout)


# ---------------------------------------------------------------------------
# Row-tile selection from a per-generation VMEM budget.
# ---------------------------------------------------------------------------
def _vmem_budget_bytes():
    # v7x has only 64 MiB physical VMEM (vs 128 MiB on v5e/v6e); keep ample
    # headroom for double-buffered DMA blocks and compiler scratch.
    try:
        cap = pltpu.get_tpu_info().vmem_capacity_bytes
    except Exception:
        cap = 64 * 1024 * 1024  # conservative fallback (v7x physical)
    return min(cap // 3, 24 * 1024 * 1024)


def _pick_row_tile(H, W, Cin, Cmid, Cout, budget_bytes, max_m=2048):
    """Largest divisor of H whose estimated VMEM use fits the budget."""
    # Per-output-row estimate: double-buffered in/out blocks + in-kernel
    # intermediates (xs, xs_f, rolls, x_l/x_r, xcat, xw, acc, h, y).
    per_row = W * (46 * Cin + 6 * Cmid + 12 * Cout)
    fixed = (4 * (9 * Cin * Cmid + Cmid * Cout)        # bf16 weights, 2x buf
             + 8 * (Cmid + Cout)                       # f32 biases, 2x buf
             + 16 * W * Cin)                           # halo row blocks
    th_cap = max(1, min((budget_bytes - fixed) // max(per_row, 1),
                        max(max_m // W, 1)))
    best = 1
    for th in range(1, H + 1):
        if H % th == 0 and th <= th_cap:
            best = th
    return best


# ---------------------------------------------------------------------------
# Wrapper: grid / BlockSpec plumbing + PixelShuffle rearrangement.
# ---------------------------------------------------------------------------
def bisenet_output_forward(x, params, *, up_factor, row_tile=None):
    """x: (B, H, W, Cin) f32 NHWC.  Returns (B, H*up, W*up, n_classes) f32."""
    w3x3, bn_scale, bn_bias, w1x1, b1x1 = params
    B, H, W, Cin = x.shape
    Cmid = w3x3.shape[-1]
    Cout = w1x1.shape[-1]
    r = up_factor
    n_classes = Cout // (r * r)

    if row_tile is None:
        TH = _pick_row_tile(H, W, Cin, Cmid, Cout, _vmem_budget_bytes())
    else:
        TH = min(row_tile, H)
    assert H % TH == 0, "row_tile must divide H"
    n_row_tiles = H // TH

    # bf16 at the kernel boundary: halves HBM traffic, feeds the bf16 MXU.
    xb = x.astype(jnp.bfloat16)
    # Fold the BN scale into the 3x3 weights, then flatten the 3x3 taps along
    # K in (ky, kx, cin) order to match the in-kernel [x_l | x | x_r] concat.
    w3 = (w3x3 * bn_scale.reshape(1, 1, 1, Cmid)) \
        .reshape(9 * Cin, Cmid).astype(jnp.bfloat16)
    w1 = w1x1.astype(jnp.bfloat16)
    bias = bn_bias.reshape(1, Cmid).astype(jnp.float32)
    b1 = b1x1.reshape(1, Cout).astype(jnp.float32)

    x_spec = pl.BlockSpec((1, TH, W, Cin), lambda b, i: (b, i, 0, 0))
    # 1-row halo blocks with clamped row index; the kernel zeroes the clamped
    # (out-of-image) rows via jnp.where, so no host-side jnp.pad is needed.
    top_spec = pl.BlockSpec((1, 1, W, Cin),
                            lambda b, i: (b, jnp.maximum(i * TH - 1, 0), 0, 0))
    bot_spec = pl.BlockSpec((1, 1, W, Cin),
                            lambda b, i: (b, jnp.minimum((i + 1) * TH, H - 1), 0, 0))
    # Weights / bias: constant block index -> stay resident in VMEM.
    w3_spec = pl.BlockSpec((9 * Cin, Cmid), lambda b, i: (0, 0))
    bias_spec = pl.BlockSpec((1, Cmid), lambda b, i: (0, 0))
    w1_spec = pl.BlockSpec((Cmid, Cout), lambda b, i: (0, 0))
    b1_spec = pl.BlockSpec((1, Cout), lambda b, i: (0, 0))
    out_spec = pl.BlockSpec((1, TH, W, Cout), lambda b, i: (b, i, 0, 0))

    flops = 2 * B * H * W * Cmid * (9 * Cin + Cout)
    bytes_accessed = (B * H * W * Cin * 2
                      + (9 * Cin * Cmid + Cmid * Cout) * 2
                      + (Cmid + Cout) * 4
                      + B * H * W * Cout * 4)

    y = pl.pallas_call(
        _bisenet_output_kernel,
        grid=(B, n_row_tiles),
        in_specs=[x_spec, top_spec, bot_spec, w3_spec, bias_spec,
                  w1_spec, b1_spec],
        out_specs=out_spec,
        out_shape=jax.ShapeDtypeStruct((B, H, W, Cout), jnp.float32),
        compiler_params=pltpu.CompilerParams(
            # batch and row-tiles are independent -> v7x megacore can shard.
            dimension_semantics=("parallel", "parallel"),
            vmem_limit_bytes=32 * 1024 * 1024,
        ),
        cost_estimate=pl.CostEstimate(
            flops=int(flops), transcendentals=0,
            bytes_accessed=int(bytes_accessed)),
    )(xb, xb, xb, w3, bias, w1, b1)

    # nn.PixelShuffle(up): (B,H,W,C*r*r) -> (B,H*r,W*r,C); pure rearrangement.
    # TODO(synk): could be fused into the kernel's output write (see review);
    #             kept in XLA to guarantee clean lowering.
    y = y.reshape(B, H, W, n_classes, r, r)
    y = jnp.transpose(y, (0, 1, 4, 2, 5, 3))
    return y.reshape(B, H * r, W * r, n_classes)


# ---------------------------------------------------------------------------
# Deterministic params (kaiming_normal_(a=1), zero bias, eval-mode BN fold).
# ---------------------------------------------------------------------------
def make_params(key, in_chan, mid_chan, n_classes, up_factor, eps=1e-5):
    out_chan = n_classes * up_factor * up_factor
    k3, k1 = jax.random.split(key)
    # kaiming_normal_(a=1) -> std = 1/sqrt(fan_in)
    w3 = jax.random.normal(k3, (3, 3, in_chan, mid_chan), jnp.float32) \
        / jnp.sqrt(jnp.float32(9 * in_chan))
    w1 = jax.random.normal(k1, (mid_chan, out_chan), jnp.float32) \
        / jnp.sqrt(jnp.float32(mid_chan))
    b1 = jnp.zeros((out_chan,), jnp.float32)
    # eval-mode BatchNorm with PyTorch default stats, folded to scale/bias.
    gamma = jnp.ones((mid_chan,), jnp.float32)
    beta = jnp.zeros((mid_chan,), jnp.float32)
    run_mean = jnp.zeros((mid_chan,), jnp.float32)
    run_var = jnp.ones((mid_chan,), jnp.float32)
    scale = gamma / jnp.sqrt(run_var + eps)
    bias = beta - run_mean * scale
    return w3, scale, bias, w1, b1


def reference_forward(x, params, up_factor):
    """Pure-XLA reference (f32, HIGHEST precision) for a numerical sanity check."""
    w3, scale, bias, w1, b1 = params
    y = jax.lax.conv_general_dilated(
        x, w3, window_strides=(1, 1), padding="SAME",
        dimension_numbers=("NHWC", "HWIO", "NHWC"),
        precision=jax.lax.Precision.HIGHEST)
    y = jnp.maximum(y * scale + bias, 0.0)
    y = jnp.einsum("bhwc,cd->bhwd", y, w1,
                   precision=jax.lax.Precision.HIGHEST) + b1
    B, H, W, _ = x.shape
    r = up_factor
    C = w1.shape[-1] // (r * r)
    y = y.reshape(B, H, W, C, r, r)
    y = jnp.transpose(y, (0, 1, 4, 2, 5, 3))
    return y.reshape(B, H * r, W * r, C)


if __name__ == "__main__":
    key = jax.random.PRNGKey(0)
    k_x, k_p = jax.random.split(key)

    # Small, lane-aligned shapes: in_chan=128, mid_chan=128,
    # n_classes=8, up_factor=4 -> out_chan = 8*4*4 = 128.
    B, H, W = 2, 16, 16
    in_chan, mid_chan = 128, 128
    n_classes, up_factor = 8, 4

    x = jax.random.normal(k_x, (B, H, W, in_chan), jnp.float32)
    params = make_params(k_p, in_chan, mid_chan, n_classes, up_factor)

    fwd = jax.jit(functools.partial(bisenet_output_forward, params=params,
                                    up_factor=up_factor))
    out = fwd(x)
    jax.block_until_ready(out)

    assert out.shape == (B, H * up_factor, W * up_factor, n_classes)
    assert out.dtype == jnp.float32

    # Kernel uses bf16 MXU inputs with f32 accumulation -> loose tolerance.
    ref = reference_forward(x, params, up_factor)
    max_err = float(jnp.max(jnp.abs(out - ref)))
    assert max_err < 0.1, f"max abs error vs reference: {max_err}"

    print("KERNEL_OK")
</pallas_src>

<mosaic_0001>
module attributes {stable_mosaic.version = 11 : i64} {
  func.func @_bisenet_output_kernel(%arg0: i32, %arg1: i32, %arg2: memref<1x16x16x128xbf16, #tpu.memory_space<vmem>>, %arg3: memref<1x1x16x128xbf16, #tpu.memory_space<vmem>>, %arg4: memref<1x1x16x128xbf16, #tpu.memory_space<vmem>>, %arg5: memref<1152x128xbf16, #tpu.memory_space<vmem>>, %arg6: memref<1x128xf32, #tpu.memory_space<vmem>>, %arg7: memref<128x128xbf16, #tpu.memory_space<vmem>>, %arg8: memref<1x128xf32, #tpu.memory_space<vmem>>, %arg9: memref<1x16x16x128xf32, #tpu.memory_space<vmem>>) attributes {dimension_semantics = [#tpu.dimension_semantics<parallel>, #tpu.dimension_semantics<parallel>], iteration_bounds = array<i64: 2, 1>, scalar_prefetch = 0 : i64, scratch_operands = 0 : i64, tpu.core_type = #tpu.core_type<tc>, window_params = [{transform_indices = @transform_0, window_bounds = array<i64: 1, 16, 16, 128>}, {transform_indices = @transform_1, window_bounds = array<i64: 1, 1, 16, 128>}, {transform_indices = @transform_2, window_bounds = array<i64: 1, 1, 16, 128>}, {pipeline_mode = #tpu.pipeline_mode<synchronous>, transform_indices = @transform_3, window_bounds = array<i64: 1152, 128>}, {pipeline_mode = #tpu.pipeline_mode<synchronous>, transform_indices = @transform_4, window_bounds = array<i64: 1, 128>}, {pipeline_mode = #tpu.pipeline_mode<synchronous>, transform_indices = @transform_5, window_bounds = array<i64: 128, 128>}, {pipeline_mode = #tpu.pipeline_mode<synchronous>, transform_indices = @transform_6, window_bounds = array<i64: 1, 128>}, {transform_indices = @transform_7, window_bounds = array<i64: 1, 16, 16, 128>}]} {
    %c0 = arith.constant 0 : index
    %c0_0 = arith.constant 0 : index
    %c0_1 = arith.constant 0 : index
    %c0_2 = arith.constant 0 : index
    %0 = vector.load %arg3[%c0, %c0_0, %c0_1, %c0_2] : memref<1x1x16x128xbf16, #tpu.memory_space<vmem>>, vector<1x1x16x128xbf16>
    %1 = vector.shape_cast %0 : vector<1x1x16x128xbf16> to vector<16x128xbf16>
    %c0_3 = arith.constant 0 : index
    %c0_4 = arith.constant 0 : index
    %c0_5 = arith.constant 0 : index
    %c0_6 = arith.constant 0 : index
    %2 = vector.load %arg4[%c0_3, %c0_4, %c0_5, %c0_6] : memref<1x1x16x128xbf16, #tpu.memory_space<vmem>>, vector<1x1x16x128xbf16>
    %3 = vector.shape_cast %2 : vector<1x1x16x128xbf16> to vector<16x128xbf16>
    %c0_i32 = arith.constant 0 : i32
    %4 = arith.cmpi sgt, %arg1, %c0_i32 : i32
    %cst = arith.constant 0.000000e+00 : bf16
    %5 = vector.broadcast %cst : bf16 to vector<16x128xbf16>
    %6 = arith.select %4, %1, %5 : vector<16x128xbf16>
    %c0_i32_7 = arith.constant 0 : i32
    %7 = arith.cmpi slt, %arg1, %c0_i32_7 : i32
    %cst_8 = arith.constant 0.000000e+00 : bf16
    %8 = vector.broadcast %cst_8 : bf16 to vector<16x128xbf16>
    %9 = arith.select %7, %3, %8 : vector<16x128xbf16>
    %c0_9 = arith.constant 0 : index
    %c0_10 = arith.constant 0 : index
    %c0_11 = arith.constant 0 : index
    %c0_12 = arith.constant 0 : index
    %10 = vector.load %arg2[%c0_9, %c0_10, %c0_11, %c0_12] : memref<1x16x16x128xbf16, #tpu.memory_space<vmem>>, vector<1x16x16x128xbf16>
    %11 = vector.shape_cast %10 : vector<1x16x16x128xbf16> to vector<16x16x128xbf16>
    %12 = vector.shape_cast %11 : vector<16x16x128xbf16> to vector<256x128xbf16>
    %13 = tpu.concatenate %6, %12, %9 in 0 : vector<16x128xbf16>, vector<256x128xbf16>, vector<16x128xbf16> -> vector<288x128xbf16>
    %14 = tpu.iota {dimensions = array<i32: 0>} : vector<288x1xi32>
    %c15_i32 = arith.constant 15 : i32
    %15 = vector.broadcast %c15_i32 : i32 to vector<288x1xi32>
    %16 = arith.andi %14, %15 : vector<288x1xi32>
    %17 = arith.extf %13 : vector<288x128xbf16> to vector<288x128xf32>
    %c0_i32_13 = arith.constant 0 : i32
    %18 = vector.broadcast %c0_i32_13 : i32 to vector<288x1xi32>
    %19 = arith.cmpi eq, %16, %18 : vector<288x1xi32>
    %c1_i32 = arith.constant 1 : i32
    %20 = tpu.dynamic_rotate %17 by %c1_i32 dim 0 : vector<288x128xf32>, i32 -> vector<288x128xf32>
    %cst_14 = arith.constant 0.000000e+00 : f32
    %21 = vector.shape_cast %19 : vector<288x1xi1> to vector<288x1xi1>
    %22 = vector.broadcast %21 : vector<288x1xi1> to vector<288x128xi1>
    %23 = vector.broadcast %cst_14 : f32 to vector<288x128xf32>
    %24 = arith.select %22, %23, %20 : vector<288x128xi1>, vector<288x128xf32>
    %25 = arith.truncf %24 : vector<288x128xf32> to vector<288x128xbf16>
    %c15_i32_15 = arith.constant 15 : i32
    %26 = vector.broadcast %c15_i32_15 : i32 to vector<288x1xi32>
    %27 = arith.cmpi eq, %16, %26 : vector<288x1xi32>
    %c287_i32 = arith.constant 287 : i32
    %28 = tpu.dynamic_rotate %17 by %c287_i32 dim 0 : vector<288x128xf32>, i32 -> vector<288x128xf32>
    %cst_16 = arith.constant 0.000000e+00 : f32
    %29 = vector.shape_cast %27 : vector<288x1xi1> to vector<288x1xi1>
    %30 = vector.broadcast %29 : vector<288x1xi1> to vector<288x128xi1>
    %31 = vector.broadcast %cst_16 : f32 to vector<288x128xf32>
    %32 = arith.select %30, %31, %28 : vector<288x128xi1>, vector<288x128xf32>
    %33 = arith.truncf %32 : vector<288x128xf32> to vector<288x128xbf16>
    %34 = tpu.concatenate %25, %13, %33 in 1 : vector<288x128xbf16>, vector<288x128xbf16>, vector<288x128xbf16> -> vector<288x384xbf16>
    %35 = vector.extract_strided_slice %34 {offsets = [0, 0], sizes = [256, 384], strides = [1, 1]} : vector<288x384xbf16> to vector<256x384xbf16>
    %36 = vector.extract_strided_slice %34 {offsets = [16, 0], sizes = [256, 384], strides = [1, 1]} : vector<288x384xbf16> to vector<256x384xbf16>
    %37 = vector.extract_strided_slice %34 {offsets = [32, 0], sizes = [256, 384], strides = [1, 1]} : vector<288x384xbf16> to vector<256x384xbf16>
    %38 = tpu.concatenate %35, %36, %37 in 1 : vector<256x384xbf16>, vector<256x384xbf16>, vector<256x384xbf16> -> vector<256x1152xbf16>
    %c0_17 = arith.constant 0 : index
    %c0_18 = arith.constant 0 : index
    %39 = vector.load %arg5[%c0_17, %c0_18] : memref<1152x128xbf16, #tpu.memory_space<vmem>>, vector<1152x128xbf16>
    %cst_19 = arith.constant dense<0.000000e+00> : vector<256x128xf32>
    %40 = tpu.matmul %38, %39, %cst_19 {dimension_numbers = #tpu.dot_dimension_numbers<[1], [0], [0], [1], [0, 0, 1, 1], [], []>} : vector<256x1152xbf16>, vector<1152x128xbf16>, vector<256x128xf32> -> vector<256x128xf32>
    %c0_20 = arith.constant 0 : index
    %c0_21 = arith.constant 0 : index
    %41 = vector.load %arg6[%c0_20, %c0_21] : memref<1x128xf32, #tpu.memory_space<vmem>>, vector<1x128xf32>
    %42 = vector.broadcast %41 : vector<1x128xf32> to vector<256x128xf32>
    %43 = arith.addf %40, %42 : vector<256x128xf32>
    %cst_22 = arith.constant 0.000000e+00 : f32
    %44 = vector.broadcast %cst_22 : f32 to vector<256x128xf32>
    %45 = arith.maximumf %43, %44 : vector<256x128xf32>
    %46 = arith.truncf %45 : vector<256x128xf32> to vector<256x128xbf16>
    %c0_23 = arith.constant 0 : index
    %c0_24 = arith.constant 0 : index
    %47 = vector.load %arg7[%c0_23, %c0_24] : memref<128x128xbf16, #tpu.memory_space<vmem>>, vector<128x128xbf16>
    %cst_25 = arith.constant dense<0.000000e+00> : vector<256x128xf32>
    %48 = tpu.matmul %46, %47, %cst_25 {dimension_numbers = #tpu.dot_dimension_numbers<[1], [0], [0], [1], [0, 0, 1, 1], [], []>} : vector<256x128xbf16>, vector<128x128xbf16>, vector<256x128xf32> -> vector<256x128xf32>
    %c0_26 = arith.constant 0 : index
    %c0_27 = arith.constant 0 : index
    %49 = vector.load %arg8[%c0_26, %c0_27] : memref<1x128xf32, #tpu.memory_space<vmem>>, vector<1x128xf32>
    %50 = vector.broadcast %49 : vector<1x128xf32> to vector<256x128xf32>
    %51 = arith.addf %48, %50 : vector<256x128xf32>
    %52 = vector.shape_cast %51 : vector<256x128xf32> to vector<16x16x128xf32>
    %c0_28 = arith.constant 0 : index
    %c0_29 = arith.constant 0 : index
    %c0_30 = arith.constant 0 : index
    %c0_31 = arith.constant 0 : index
    %53 = vector.load %arg9[%c0_28, %c0_29, %c0_30, %c0_31] : memref<1x16x16x128xf32, #tpu.memory_space<vmem>>, vector<1x16x16x128xf32>
    %54 = vector.shape_cast %53 : vector<1x16x16x128xf32> to vector<16x16x128xf32>
    %55 = vector.shape_cast %52 : vector<16x16x128xf32> to vector<1x16x16x128xf32>
    tpu.vector_store %arg9[%c0_28, %c0_29, %c0_30, %c0_31], %55 {strides = array<i32>} : memref<1x16x16x128xf32, #tpu.memory_space<vmem>>, vector<1x16x16x128xf32>,
    return
  }
  func.func @transform_0(%arg0: i32, %arg1: i32) -> (i32, i32, i32, i32) {
    %c0_i32 = arith.constant 0 : i32
    %c0_i32_0 = arith.constant 0 : i32
    %c0_i32_1 = arith.constant 0 : i32
    return %arg0, %arg1, %c0_i32, %c0_i32_0 : i32, i32, i32, i32
  }
  func.func @transform_1(%arg0: i32, %arg1: i32) -> (i32, i32, i32, i32) {
    %c16_i32 = arith.constant 16 : i32
    %0 = arith.muli %arg1, %c16_i32 : i32
    %c1_i32 = arith.constant 1 : i32
    %1 = arith.subi %0, %c1_i32 : i32
    %c0_i32 = arith.constant 0 : i32
    %2 = arith.maxsi %1, %c0_i32 : i32
    %c0_i32_0 = arith.constant 0 : i32
    %c0_i32_1 = arith.constant 0 : i32
    %c0_i32_2 = arith.constant 0 : i32
    return %arg0, %2, %c0_i32_0, %c0_i32_1 : i32, i32, i32, i32
  }
  func.func @transform_2(%arg0: i32, %arg1: i32) -> (i32, i32, i32, i32) {
    %c1_i32 = arith.constant 1 : i32
    %0 = arith.addi %arg1, %c1_i32 : i32
    %c16_i32 = arith.constant 16 : i32
    %1 = arith.muli %0, %c16_i32 : i32
    %c15_i32 = arith.constant 15 : i32
    %2 = arith.minsi %1, %c15_i32 : i32
    %c0_i32 = arith.constant 0 : i32
    %c0_i32_0 = arith.constant 0 : i32
    %c0_i32_1 = arith.constant 0 : i32
    return %arg0, %2, %c0_i32, %c0_i32_0 : i32, i32, i32, i32
  }
  func.func @transform_3(%arg0: i32, %arg1: i32) -> (i32, i32) {
    %c0_i32 = arith.constant 0 : i32
    %c0_i32_0 = arith.constant 0 : i32
    %c0_i32_1 = arith.constant 0 : i32
    return %c0_i32, %c0_i32_0 : i32, i32
  }
  func.func @transform_4(%arg0: i32, %arg1: i32) -> (i32, i32) {
    %c0_i32 = arith.constant 0 : i32
    %c0_i32_0 = arith.constant 0 : i32
    %c0_i32_1 = arith.constant 0 : i32
    return %c0_i32, %c0_i32_0 : i32, i32
  }
  func.func @transform_5(%arg0: i32, %arg1: i32) -> (i32, i32) {
    %c0_i32 = arith.constant 0 : i32
    %c0_i32_0 = arith.constant 0 : i32
    %c0_i32_1 = arith.constant 0 : i32
    return %c0_i32, %c0_i32_0 : i32, i32
  }
  func.func @transform_6(%arg0: i32, %arg1: i32) -> (i32, i32) {
    %c0_i32 = arith.constant 0 : i32
    %c0_i32_0 = arith.constant 0 : i32
    %c0_i32_1 = arith.constant 0 : i32
    return %c0_i32, %c0_i32_0 : i32, i32
  }
  func.func @transform_7(%arg0: i32, %arg1: i32) -> (i32, i32, i32, i32) {
    %c0_i32 = arith.constant 0 : i32
    %c0_i32_0 = arith.constant 0 : i32
    %c0_i32_1 = arith.constant 0 : i32
    return %arg0, %arg1, %c0_i32, %c0_i32_0 : i32, i32, i32, i32
  }
}

</mosaic_0001>

<bundles_post_ra>
// kernel: bisenet_output_forward.1
= control target key start
LH: loop header
LB: loop body
LE: loop exit
PB: predicated region body
PF: predicated region fallthrough
CT: control target
= control target key end

     0   :  { %12 = vsyncpa [#allocation3], 0  ;;  %s5980_s0 = inlined_call_operand.vmem [shape: bf16[2,16,16,128], index: 0, kind: input, shape index: {}, may-alias: {0,1,2}]   ;;  %s5981_s1 = inlined_call_operand.vmem [shape: bf16[2,16,16,128], index: 1, kind: input, shape index: {}, may-alias: {0,1,2}]   ;;  %s5982_s2 = inlined_call_operand.vmem [shape: bf16[2,16,16,128], index: 2, kind: input, shape index: {}, may-alias: {0,1,2}]   ;;  %s5983_s3 = inlined_call_operand.hbm [shape: bf16[1152,128], index: 3, kind: input, shape index: {}]   ;;  %s5984_s4 = inlined_call_operand.vmem [shape: f32[1,128], index: 4, kind: input, shape index: {}, may-alias: {4,6}]   ;;  %s5985_s5 = inlined_call_operand.hbm [shape: bf16[128,128], index: 5, kind: input, shape index: {}]   ;;  %s5986_s6 = inlined_call_operand.vmem [shape: f32[1,128], index: 6, kind: input, shape index: {}, may-alias: {4,6}]   ;;  %s5987_s7 = inlined_call_operand.vmem [shape: f32[2,16,16,128], index: 7, kind: output, shape index: {}]  }
   0x1   :  { %13 = vsyncpa [#allocation5], 0  ;;  %s4490_s1 = smov 0   ;;  %s4492_s2 = smov 0  }
   0x2   :  { %s4494_s24 = smov 0  }
   0x3 LB: > { %s3073_s25 = sadd.s32 4294967295, %s4442_s24   ;;  %s31_s26 = sadd.s32 1, %s4438_s2  ;;  %s4442_s24 = sphi %s4494_s24, %s19_s24   ;;  %s4438_s2 = sphi %s4492_s2, %s6327_s2   ;;  %s4434_s1 = sphi %s4490_s1, %s6326_s1  }
   0x4   : > { %p33_p0 = scmp.ge.s32.totalorder %s31_s26, 2  ;;  %p3075_p1 = scmp.ge.s32.totalorder %s4442_s24, 1 }
   0x5   : > { %p248_p2 = scmp.lt.s32.totalorder %s4442_s24, 3  ;;  %p4515_p4 = scmp.eq.s32.totalorder %s3073_s25, 0 }
   0x6   : > { %s6329_s26 = smov (%p33_p0, %s31_s26), 0  ;;  %s4444_s29 = smov [#allocation2]  }
   0x7   : > { %p4511_p3 = pnand %p3075_p1, %p248_p2  ;;  %s260_s30 = sshll.u32 %s4444_s29, 4  ;;  %s261_s30 = int_to_ptr.vmem [resolvable:$true] %s260_s30 }
   0x8   : > { %s4445_s9 = smov [#allocation4]   ;;  %s4371_s11 = scalar_lea.vmem %s261_s30, 9216 }
   0x9   : > { %p4217_p5 = pneg %p4511_p3  ;;  %s276_s10 = sshll.u32 %s4445_s9, 4  ;;  %s277_s10 = int_to_ptr.vmem [resolvable:$true] %s276_s10 }
   0xa   : > { %p4372_p8 = scmp.ne.s32.totalorder %s261_s30, %s4371_s11  ;;  %p4379_p11 = scmp.lt.s32.totalorder %s261_s30, %s261_s30 }
   0xb   : > { %p4523_p6 = pnand %p4515_p4, %p4217_p5  ;;  %p4380_p12 = scmp.lt.s32.totalorder %s4371_s11, %s4371_s11 }
   0xd   : > { %p4362_p7 = pneg %p4523_p6  ;;  %p4381_p13 = por %p4380_p12, %p4379_p11 }
   0xf   : > { %p4374_p9 = pnand %p4372_p8, %p4362_p7 }
  0x11   : > { %p4375_p10 = pneg %p4374_p9 }
  0x13   : > { %p4382_p0 = pnand %p4381_p13, %p4375_p10 }
  0x15   : > { %4385 = shalt.err (!%p4382_p0)
}
  0x16   : > { %s4446_s12 = smov 64   ;;  %s4447_s13 = smov 4  }
  0x17   : > { %4220 = dma.hbm_to_vmem [thread:$0]  (!%p4523_p6), %s5983_s3, 9216, %s261_s30, [#allocation3], %s4446_s12, %s4446_s12, %s4447_s13  }
  0x18   : > { %s4397_s16 = scalar_lea.vmem %s277_s10, 1024  ;;  %p4405_p8 = scmp.lt.s32.totalorder %s277_s10, %s277_s10 }
  0x19   : > { %p4398_p1 = scmp.ne.s32.totalorder %s277_s10, %s4397_s16  ;;  %p4406_p9 = scmp.lt.s32.totalorder %s4397_s16, %s4397_s16 }
  0x1b   : > { %p4400_p2 = pnand %p4398_p1, %p4362_p7  ;;  %p4407_p11 = por %p4406_p9, %p4405_p8 }
  0x1d   : > { %p4401_p5 = pneg %p4400_p2 }
  0x1f   : > { %p4408_p10 = pnand %p4407_p11, %p4401_p5 }
  0x21   : > { %4411 = shalt.err (!%p4408_p10)
}
  0x22   : > { %4223 = dma.hbm_to_vmem [thread:$0]  (!%p4523_p6), %s5985_s5, 1024, %s277_s10, [#allocation5], %s4446_s12, %s4446_s12, %s4447_s13  }
  0x23   : > { %349 = sbr.rel (%p4511_p3) target bundleno = 796 (0x31c), region = 48 }
  0x28   : > { %4425 = dma.done.wait (%p4515_p4), [#allocation3], 9216  }
  0x29   : > { %4427 = vsyncadd (%p4515_p4), [#allocation3], 4294958080 }
  0x2a   : > { %4429 = dma.done.wait (%p4515_p4), [#allocation5], 1024  }
  0x2b   : > { %4431 = vsyncadd (%p4515_p4), [#allocation5], 4294966272  ;;  %v634_v0 = vlaneseq  ;;  %v4448_v1 = vmov 0   ;;  %v4258_v8 = vld [vmem:[#allocation2 + $0x78] sm:$0xff]   ;;  %v4262_v15 = vld [vmem:[#allocation2 + $0x70] sm:$0xff]   ;;  %p422_p3 = scmp.lt.s32.totalorder %s4434_s1, 1 }
  0x2c   : > { %v4555_v2 = vcombine.low %v4448_v1, %v4448_v1  ;;  %v4259_v11 = vld [vmem:[#allocation2 + $0x38] sm:$0xff]   ;;  %3617 = vmatprep.subr.bf16.mxu0 %v4258_v8  ;;  %v4263_v16 = vld [vmem:[#allocation2 + $0x30] sm:$0xff]   ;;  %v4266_v19 = vld [vmem:[#allocation2 + $0x68] sm:$0xff]   ;;  %vm5990_vm3 = vmmov 1  }
  0x2d   : > { %v4560_v5 = vshrl.u32 %v634_v0, 7  ;;  %v4260_v13 = vld [vmem:[#allocation2 + $0xf8] sm:$0xff]   ;;  %3618 = vmatpush3.bf16.msra.mxu0 %v4259_v11  ;;  %v4264_v17 = vld [vmem:[#allocation2 + $0xf0] sm:$0xff]   ;;  %v4267_v20 = vld [vmem:[#allocation2 + $0x28] sm:$0xff]   ;;  %s6331_s1 = smov (!%p422_p3, %s4434_s1), 1 }
  0x2e   : > { %6068 = vst [vmem:[#allocation8_spill] sm:$0xff] %v4555_v2  ;;  %1828 = vmatprep.mubr.bf16.mxu0 %v4555_v2  ;;  %v707_v3 = vunpack.c.l.bf16 %v4555_v2  ;;  %v708_v4 = vunpack.c.h.bf16 %v4555_v2  ;;  %v4261_v14 = vld [vmem:[#allocation2 + $0xb8] sm:$0xff]   ;;  %3729 = vmatprep.subr.bf16.mxu1 %v4260_v13  ;;  %v4265_v18 = vld [vmem:[#allocation2 + $0xb0] sm:$0xff]   ;;  %v4268_v21 = vld [vmem:[#allocation2 + $0xe8] sm:$0xff]   ;;  %s3576_s19 = sshll.u32 %s6331_s1, 7  ;;  %s3580_s27 = sshll.u32 %s6331_s1, 8 }
  0x2f   : > { %vm5988_vm0 = vcmp.lt.s32.totalorder %v4560_v5, 7  ;;  %3730 = vmatpush3.bf16.msra.mxu1 %v4261_v14  ;;  %3619 = vmatprep.subr.bf16.mxu0 %v4262_v15  ;;  %v4269_v22 = vld [vmem:[#allocation2 + $0xa8] sm:$0xff]   ;;  %v4270_v23 = vld [vmem:[#allocation2 + $0x60] sm:$0xff]   ;;  %v4274_v27 = vld [vmem:[#allocation2 + $0x58] sm:$0xff]   ;;  %vm5989_vm1 = vcmp.lt.s32.totalorder %v4560_v5, 1  ;;  %v671_v40 = vand.u32 15, %v4560_v5  ;;  %s4604_s22 = scalar_lea.vmem %s5980_s0, %s3576_s19  ;;  %s5905_s9 = scalar_lea.vmem %s5987_s7, %s3580_s27 }
  0x30   : > { %v4562_v6 = vrot.slane %v707_v3, 1  ;;  %v4564_v7 = vrot.slane %v708_v4, 1  ;;  %3731 = vmatprep.subr.bf16.mxu1 %v4264_v17  ;;  %v4271_v24 = vld [vmem:[#allocation2 + $0x20] sm:$0xff]   ;;  %v4275_v28 = vld [vmem:[#allocation2 + $0x18] sm:$0xff]   ;;  %v4278_v31 = vld [vmem:[#allocation2 + $0x50] sm:$0xff]   ;;  %v779_v34 = vrot.slane %v707_v3, 7 }
  0x31   : > { %3620 = vmatpush3.bf16.msra.mxu0 %v4263_v16  ;;  %v4272_v25 = vld [vmem:[#allocation2 + $0xe0] sm:$0xff]   ;;  %v4276_v29 = vld [vmem:[#allocation2 + $0xd8] sm:$0xff]   ;;  %v4279_v32 = vld [vmem:[#allocation2 + $0x10] sm:$0xff]   ;;  %v4585_v36 = vrot.slane %v708_v4, 7  ;;  %v637_v45 = vadd.s32 16, %v4560_v5  ;;  %v636_v47 = vadd.s32 8, %v4560_v5 }
  0x32   : > { %6069 = vst [vmem:[#allocation9_spill] sm:$0xff] %v4562_v6  ;;  %v4571_v9 = vsel %vm5988_vm0, %v4562_v6, %v4564_v7  ;;  %v4577_v10 = vsel %vm5988_vm0, %v4564_v7, %v4562_v6  ;;  %3621 = vmatprep.subr.bf16.mxu0 %v4266_v19  ;;  %v4273_v26 = vld [vmem:[#allocation2 + $0xa0] sm:$0xff]   ;;  %v4277_v30 = vld [vmem:[#allocation2 + $0x98] sm:$0xff]   ;;  %v4280_v33 = vld [vmem:[#allocation2 + $0xd0] sm:$0xff]   ;;  %vm3581_vm2 = vcmp.ne.s32.totalorder %v671_v40, 0  ;;  %v639_v52 = vadd.s32 32, %v4560_v5 }
  0x33   : > { %6070 = vst [vmem:[#allocation10_spill] sm:$0xff] %v4571_v9  ;;  %6071 = vst [vmem:[#allocation11_spill] sm:$0xff] %v4577_v10  ;;  %3732 = vmatpush3.bf16.msra.mxu1 %v4265_v18  ;;  %v4281_v35 = vld [vmem:[#allocation2 + $0x90] sm:$0xff]   ;;  %v4282_v37 = vld [vmem:[#allocation2 + $0x48] sm:$0xff]   ;;  %v4593_v42 = vsel %vm5989_vm1, %v779_v34, %v4585_v36  ;;  %v851_v43 = vsel %vm5989_vm1, %v4585_v36, %v779_v34  ;;  %v673_v53 = vand.u32 15, %v637_v45  ;;  %v672_v54 = vand.u32 15, %v636_v47 }
  0x34   : > { %3733 = vmatprep.subr.bf16.mxu1 %v4268_v21  ;;  %v4283_v38 = vld [vmem:[#allocation2 + $0x8] sm:$0xff]   ;;  %6072 = vst [vmem:[#allocation12_spill] sm:$0xff] %v4593_v42  ;;  %v4286_v44 = vld [vmem:[#allocation2 + $0x40] sm:$0xff]   ;;  %v3183_v49 = vpack.c.bf16 %v4593_v42, %v851_v43  ;;  %v4607_v51 = vld [vmem:[%s4604_s22 + $0x78] sm:$0xff]   ;;  %v638_v57 = vadd.s32 24, %v4560_v5  ;;  %v675_v61 = vand.u32 15, %v639_v52 }
  0x35   : > { %3622 = vmatpush3.bf16.msra.mxu0 %v4267_v20  ;;  %v4284_v39 = vld [vmem:[#allocation2 + $0xc8] sm:$0xff]   ;;  %v4287_v46 = vld [vmem:[#allocation2] sm:$0xff]   ;;  %6073 = vst [vmem:[#allocation13_spill] sm:$0xff] %v4607_v51  ;;  %vm3182_vm4 = vmpackc.low %vm5990_vm3, %vm3581_vm2  ;;  %v5993_v55 = vunpack.c.h.bf16 %v4607_v51  ;;  %vm3585_vm5 = vcmp.ne.s32.totalorder %v673_v53, 0  ;;  %vm4624_vm6 = vcmp.ne.s32.totalorder %v672_v54, 15  ;;  %v641_v21 = vadd.s32 48, %v4560_v5 }
  0x36   : > { %3623 = vmatprep.subr.bf16.mxu0 %v4270_v23  ;;  %v4285_v41 = vld [vmem:[#allocation2 + $0x88] sm:$0xff]   ;;  %v4288_v48 = vld [vmem:[#allocation2 + $0xc0] sm:$0xff]   ;;  %v4291_v56 = vld [vmem:[#allocation2 + $0x178] sm:$0xff]   ;;  %v674_v4 = vand.u32 15, %v638_v57  ;;  %vm4635_vm8 = vcmp.ne.s32.totalorder %v675_v61, 0  ;;  %v643_v40 = vadd.s32 64, %v4560_v5 }
  0x37   : > { %3734 = vmatpush3.bf16.msra.mxu1 %v4269_v22  ;;  %v4289_v50 = vld [vmem:[#allocation2 + $0x80] sm:$0xff]   ;;  %v4616_v59 = vrot.slane %v5993_v55, 7  ;;  %v4293_v60 = vld [vmem:[#allocation2 + $0x138] sm:$0xff]   ;;  %v4294_v0 = vld [vmem:[%s4604_s22 + $0x8] sm:$0xff]  }
  0x38   : > { %3735 = vmatprep.subr.bf16.mxu1 %v4272_v25  ;;  %v4292_v58 = vld [vmem:[%s4604_s22] sm:$0xff]   ;;  %v4295_v15 = vld [vmem:[#allocation2 + $0x170] sm:$0xff]   ;;  %vm4631_vm7 = vmpackc.low %vm5990_vm3, %vm3585_vm5  ;;  %v711_v17 = vunpack.c.l.bf16 %v4294_v0  ;;  %v712_v18 = vunpack.c.h.bf16 %v4294_v0  ;;  %vm3600_vm11 = vcmp.ne.s32.totalorder %v674_v4, 15 }
  0x39   : > { %3624 = vmatpush3.bf16.msra.mxu0 %v4271_v24  ;;  %v709_v62 = vunpack.c.l.bf16 %v4292_v58  ;;  %v710_v63 = vunpack.c.h.bf16 %v4292_v58  ;;  %v4622_v1 = vsel %vm5989_vm1, %v4616_v59, %v779_v34  ;;  %v4640_v20 = vld [vmem:[%s4604_s22 + $0x10] sm:$0xff]   ;;  %vm4654_vm9 = vmpackc.low %vm4624_vm6, %vm5990_vm3  ;;  %v4301_v53 = vld [vmem:[#allocation2 + $0x128] sm:$0xff]  }
  0x3a   : > { %3625 = vmatprep.subr.bf16.mxu0 %v4274_v27  ;;  %6074 = vst [vmem:[#allocation14_spill] sm:$0xff] %v4622_v1  ;;  %v714_v34 = vunpack.c.h.bf16 %v4640_v20  ;;  %vm4676_vm10 = vmpackc.low %vm5990_vm3, %vm4635_vm8  ;;  %v4929_v8 = vld [vmem:[%s4604_s22 + $0x48] sm:$0xff]   ;;  %v6139_v1 = vmov 0  ;;  %v5045_v6 = vld [vmem:[%s4604_s22 + $0x58] sm:$0xff]  }
  0x3b   : > { %3736 = vmatpush3.bf16.msra.mxu1 %v4273_v26  ;;  %v781_v11 = vrot.slane %v709_v62, 7  ;;  %v782_v13 = vrot.slane %v710_v63, 7  ;;  %v1016_v14 = vrot.slane %v709_v62, 1  ;;  %v1017_v24 = vrot.slane %v710_v63, 1  ;;  %v4297_v26 = vld [vmem:[#allocation2 + $0x130] sm:$0xff]   ;;  %vm4699_vm13 = vmpackc.low %vm3600_vm11, %vm5990_vm3  ;;  %v4303_v63 = vld [vmem:[#allocation2 + $0x160] sm:$0xff]  }
  0x3c   : > { %3737 = vmatprep.subr.bf16.mxu1 %v4276_v29  ;;  %v786_v45 = vrot.slane %v714_v34, 7  ;;  %6112 = vst [vmem:[#allocation16_spill] sm:$0xff] %v4929_v8  ;;  %6144 = vst [vmem:[#allocation21_spill] sm:$0xff] %v5045_v6 }
  0x3d   : > { %3626 = vmatpush3.bf16.msra.mxu0 %v4275_v28  ;;  %v848_v22 = vsel %vm5989_vm1, %v781_v11, %v782_v13  ;;  %v849_v23 = vsel %vm5989_vm1, %v4585_v36, %v781_v11  ;;  %v1084_v25 = vsel %vm5988_vm0, %v4564_v7, %v1016_v14  ;;  %v640_v7 = vadd.s32 40, %v4560_v5  ;;  %v4715_v11 = vld [vmem:[%s4604_s22 + $0x20] sm:$0xff]  }
  0x3e   : > { %3627 = vmatprep.subr.bf16.mxu0 %v4278_v31  ;;  %v3187_v27 = vpack.c.bf16 %v848_v22, %v849_v23  ;;  %v3251_v29 = vpack.c.bf16 %v1084_v25, %v4571_v9  ;;  %v784_v31 = vrot.slane %v712_v18, 7  ;;  %v1083_v47 = vsel %vm5988_vm0, %v1016_v14, %v1017_v24  ;;  %v4307_v23 = vld [vmem:[#allocation2 + $0x1f8] sm:$0xff]  }
  0x3f   : > { %3738 = vmatpush3.bf16.msra.mxu1 %v4277_v30  ;;  %v783_v30 = vrot.slane %v711_v17, 7  ;;  %v676_v54 = vand.u32 15, %v640_v7  ;;  %v642_v14 = vadd.s32 56, %v4560_v5  ;;  %v718_v22 = vunpack.c.h.bf16 %v4715_v11  ;;  %v4308_v25 = vld [vmem:[#allocation2 + $0x1b8] sm:$0xff]  }
  0x40   : > { %3739 = vmatprep.subr.bf16.mxu1 %v4280_v33  ;;  %v713_v33 = vunpack.c.l.bf16 %v4640_v20  ;;  %3248 = vmatprep.mubr.msk.bf16.mxu1 %vm4631_vm7, %v3187_v27  ;;  %v1021_v28 = vrot.slane %v714_v34, 1 }
  0x41   : > { %3628 = vmatpush3.bf16.msra.mxu0 %v4279_v32  ;;  %v1018_v32 = vrot.slane %v711_v17, 1  ;;  %v846_v36 = vsel %vm5989_vm1, %v783_v30, %v784_v31  ;;  %vm3601_vm15 = vcmp.ne.s32.totalorder %v676_v54, 15  ;;  %v790_v34 = vrot.slane %v718_v22, 7 }
  0x42   : > { %3629 = vmatprep.subr.bf16.mxu0 %v4282_v37  ;;  %v847_v37 = vsel %vm5989_vm1, %v782_v13, %v783_v30  ;;  %v1020_v62 = vrot.slane %v713_v33, 1  ;;  %v4305_v13 = vld [vmem:[#allocation2 + $0x120] sm:$0xff]   ;;  %v4309_v30 = vld [vmem:[#allocation2 + $0x158] sm:$0xff]  }
  0x43   : > { %3740 = vmatpush3.bf16.msra.mxu1 %v4281_v35  ;;  %v4663_v35 = vld [vmem:[%s4604_s22 + $0x18] sm:$0xff]   ;;  %v4683_v43 = vpack.c.bf16 %v846_v36, %v847_v37 }
  0x44   : > { %3741 = vmatprep.subr.bf16.mxu1 %v4284_v39  ;;  %v677_v39 = vand.u32 15, %v641_v21  ;;  %v716_v52 = vunpack.c.h.bf16 %v4663_v35  ;;  %v717_v21 = vunpack.c.l.bf16 %v4715_v11 }
  0x45   : > { %3630 = vmatpush3.bf16.msra.mxu0 %v4283_v38  ;;  %v4358_v38 = vld [vmem:[%s4604_s22 + $0x18] sm:$0xff]  }
  0x46   : > { %3631 = vmatprep.subr.bf16.mxu0 %v4286_v44  ;;  %v785_v44 = vrot.slane %v713_v33, 7  ;;  %vm3587_vm12 = vcmp.ne.s32.totalorder %v677_v39, 0  ;;  %v788_v4 = vrot.slane %v716_v52, 7  ;;  %v4311_v33 = vld [vmem:[#allocation2 + $0x118] sm:$0xff]   ;;  %v789_v36 = vrot.slane %v717_v21, 7 }
  0x47   : > { %3742 = vmatpush3.bf16.msra.mxu1 %v4285_v41  ;;  %v4299_v41 = vld [vmem:[#allocation2 + $0x168] sm:$0xff]   ;;  %vm4708_vm14 = vmpackc.low %vm5990_vm3, %vm3587_vm12  ;;  %v644_v39 = vadd.s32 72, %v4560_v5 }
  0x48   : > { %3743 = vmatprep.subr.bf16.mxu1 %v4288_v48  ;;  %v844_v48 = vsel %vm5989_vm1, %v785_v44, %v786_v45 }
  0x49   : > { %3632 = vmatpush3.bf16.msra.mxu0 %v4287_v46  ;;  %v1082_v46 = vsel %vm5988_vm0, %v1017_v24, %v1018_v32  ;;  %v645_v24 = vadd.s32 80, %v4560_v5  ;;  %v680_v54 = vand.u32 15, %v644_v39  ;;  %v4839_v39 = vld [vmem:[%s4604_s22 + $0x38] sm:$0xff]  }
  0x4a   : > { %3841 = vmatprep.subr.bf16.mxu0 %v4291_v56  ;;  %v4703_v57 = vpack.c.bf16 %v1082_v46, %v1083_v47  ;;  %v4314_v46 = vld [vmem:[#allocation2 + $0x1b0] sm:$0xff]   ;;  %v840_v47 = vsel %vm5989_vm1, %v789_v36, %v790_v34 }
  0x4b   : > { %3744 = vmatpush3.bf16.msra.mxu1 %v4289_v50  ;;  %v715_v50 = vunpack.c.l.bf16 %v4663_v35  ;;  %v681_v37 = vand.u32 15, %v645_v24  ;;  %vm3603_vm11 = vcmp.ne.s32.totalorder %v680_v54, 15  ;;  %v4339_v56 = vld [vmem:[#allocation2 + $0x230] sm:$0xff]  }
  0x4c   : > { %3184 = vmatmul.mubr.msk.bf16.vlgmr.msra.gmra.mxu0 %vm3182_vm4, %v3183_v49  ;;  %v845_v49 = vsel %vm5989_vm1, %v784_v31, %v785_v44  ;;  %vm4737_vm4 = vmpackc.low %vm3601_vm15, %vm5990_vm3  ;;  %3953 = vmatprep.subr.bf16.mxu1 %v4307_v23  ;;  %v1079_v44 = vsel %vm5988_vm0, %v1020_v62, %v1021_v28 }
  0x4d   : > { %1836 = vmatprep.mubr.bf16.mxu0 %v4292_v58  ;;  %3842 = vmatpush3.bf16.msra.mxu0 %v4293_v60  ;;  %v1019_v58 = vrot.slane %v712_v18, 1  ;;  %v679_v60 = vand.u32 15, %v643_v40  ;;  %v4705_v61 = vpack.c.bf16 %v844_v48, %v845_v49  ;;  %v787_v3 = vrot.slane %v715_v50, 7  ;;  %v4313_v40 = vld [vmem:[#allocation2 + $0x1f0] sm:$0xff]   ;;  %vm4830_vm15 = vmpackc.low %vm3603_vm11, %vm5990_vm3 }
  0x4e   : > { %3843 = vmatprep.subr.bf16.mxu0 %v4295_v15  ;;  %3252 = vmatmul.mubr.msk.bf16.vlgmr.msra.gmra.mxu1 %vm4654_vm9, %v3251_v29  ;;  %v4751_v29 = vld [vmem:[%s4604_s22 + $0x28] sm:$0xff]   ;;  %v841_v48 = vsel %vm5989_vm1, %v788_v4, %v789_v36  ;;  %vm3589_vm8 = vcmp.ne.s32.totalorder %v681_v37, 0  ;;  %v1025_v37 = vrot.slane %v718_v22, 1 }
  0x4f   : > { %3256 = vmatprep.mubr.msk.bf16.mxu1 %vm4676_vm10, %v4683_v43  ;;  %v1080_v15 = vsel %vm5988_vm0, %v1019_v58, %v1020_v62  ;;  %v1081_v16 = vsel %vm5988_vm0, %v1018_v32, %v1019_v58  ;;  %vm4732_vm2 = vcmp.ne.s32.totalorder %v679_v60, 0  ;;  %v842_v19 = vsel %vm5989_vm1, %v787_v3, %v788_v4  ;;  %3954 = vmatpush3.bf16.msra.mxu1 %v4308_v25  ;;  %v4315_v58 = vld [vmem:[#allocation2 + $0x150] sm:$0xff]   ;;  %vm4801_vm9 = vmpackc.low %vm5990_vm3, %vm3589_vm8 }
  0x50   : > { %v1022_v32 = vrot.slane %v715_v50, 1  ;;  %vm4758_vm5 = vmpackc.low %vm5990_vm3, %vm4732_vm2  ;;  %v719_v49 = vunpack.c.l.bf16 %v4751_v29  ;;  %v720_v50 = vunpack.c.h.bf16 %v4751_v29  ;;  %3955 = vmatprep.subr.bf16.mxu1 %v4313_v40  ;;  %v1023_v62 = vrot.slane %v716_v52, 1  ;;  %v4317_v4 = vld [vmem:[#allocation2 + $0x110] sm:$0xff]  }
  0x51   : > { %3844 = vmatpush3.bf16.msra.mxu0 %v4297_v26  ;;  %v4748_v26 = vpack.c.bf16 %v1080_v15, %v1081_v16  ;;  %v646_v52 = vadd.s32 88, %v4560_v5 }
  0x52   : > { %3845 = vmatprep.subr.bf16.mxu0 %v4299_v41  ;;  %v1078_v41 = vsel %vm5988_vm0, %v1021_v28, %v1022_v32  ;;  %v791_v16 = vrot.slane %v719_v49, 7  ;;  %v792_v17 = vrot.slane %v720_v50, 7  ;;  %v4321_v28 = vld [vmem:[#allocation2 + $0x148] sm:$0xff]  }
  0x53   : > { %3956 = vmatpush3.bf16.msra.mxu1 %v4314_v46  ;;  %v4791_v60 = vpack.c.bf16 %v1078_v41, %v1079_v44  ;;  %v682_v36 = vand.u32 15, %v646_v52  ;;  %v1026_v41 = vrot.slane %v719_v49, 1  ;;  %v4323_v46 = vld [vmem:[#allocation2 + $0x108] sm:$0xff]   ;;  %v651_v49 = vadd.s32 128, %v4560_v5  ;;  %v4327_v52 = vld [vmem:[#allocation2 + $0x140] sm:$0xff]  }
  0x54   : > { %3188 = vmatmul.mubr.msk.bf16.gmra.mxu0 %vm4631_vm7, %v3187_v27  ;;  %v678_v27 = vand.u32 15, %v642_v14  ;;  %v6097_v14 = vmov 0  ;;  %v838_v24 = vsel %vm5989_vm1, %v791_v16, %v792_v17  ;;  %v839_v25 = vsel %vm5989_vm1, %v790_v34, %v791_v16 }
  0x55   : > { %1844 = vmatprep.mubr.bf16.mxu0 %v4294_v0  ;;  %3846 = vmatpush3.bf16.msra.mxu0 %v4301_v53  ;;  %v6098_v14 = vsel %vm4801_vm9, 4294967295, %v6097_v14  ;;  %v6101_v34 = vmov 0  ;;  %v4846_v40 = vpack.c.bf16 %v838_v24, %v839_v25  ;;  %v1074_v54 = vsel %vm5988_vm0, %v1025_v37, %v1026_v41 }
  0x56   : > { %3847 = vmatprep.subr.bf16.mxu0 %v4303_v63  ;;  %3260 = vmatmul.mubr.msk.bf16.gmra.mxu1 %vm4699_vm13, %v4703_v57  ;;  %vm3602_vm6 = vcmp.ne.s32.totalorder %v678_v27, 15  ;;  %v1024_v63 = vrot.slane %v717_v21, 1  ;;  %v1077_v21 = vsel %vm5988_vm0, %v1022_v32, %v1023_v62  ;;  %v723_v16 = vunpack.c.l.bf16 %v4839_v39 }
  0x57   : > { %3264 = vmatprep.mubr.msk.bf16.mxu1 %vm4708_vm14, %v4705_v61  ;;  %vm4787_vm7 = vmpackc.low %vm3602_vm6, %vm5990_vm3  ;;  %vm3604_vm6 = vcmp.ne.s32.totalorder %v682_v36, 15 }
  0x58   : > { %vm4875_vm11 = vmpackc.low %vm3604_vm6, %vm5990_vm3  ;;  %v795_v36 = vrot.slane %v723_v16, 7 }
  0x59   : > { %3848 = vmatpush3.bf16.msra.mxu0 %v4305_v13  ;;  %v4798_v13 = vpack.c.bf16 %v840_v47, %v841_v48  ;;  %v4325_v47 = vld [vmem:[#allocation2 + $0x1e0] sm:$0xff]   ;;  %v648_v48 = vadd.s32 104, %v4560_v5 }
  0x5a   : > { %3849 = vmatprep.subr.bf16.mxu0 %v4309_v30  ;;  %v649_v30 = vadd.s32 112, %v4560_v5 }
  0x5c   : > { %3192 = vmatmul.mubr.msk.bf16.gmra.mxu0 %vm4676_vm10, %v4683_v43  ;;  %v685_v22 = vand.u32 15, %v649_v30  ;;  %v6106_v30 = vmov 0 }
  0x5d   : > { %1852 = vmatprep.mubr.bf16.mxu0 %v4640_v20  ;;  %v843_v20 = vsel %vm5989_vm1, %v786_v45, %v787_v3  ;;  %v647_v45 = vadd.s32 96, %v4560_v5  ;;  %3850 = vmatpush3.bf16.msra.mxu0 %v4311_v33  ;;  %v4796_v3 = vld [vmem:[%s4604_s22 + $0x30] sm:$0xff]  }
  0x5e   : > { %v4753_v31 = vpack.c.bf16 %v842_v19, %v843_v20  ;;  %3268 = vmatmul.mubr.msk.bf16.gmra.mxu1 %vm4737_vm4, %v4748_v26  ;;  %3851 = vmatprep.subr.bf16.mxu0 %v4315_v58  ;;  %v4320_v19 = vld [vmem:[#allocation2 + $0x1a8] sm:$0xff]   ;;  %v1076_v20 = vsel %vm5988_vm0, %v1023_v62, %v1024_v63  ;;  %v721_v23 = vunpack.c.l.bf16 %v4796_v3  ;;  %v722_v27 = vunpack.c.h.bf16 %v4796_v3  ;;  %v4326_v62 = vld [vmem:[#allocation2 + $0x1a0] sm:$0xff]  }
  0x5f   : > { %v683_v15 = vand.u32 15, %v647_v45  ;;  %v4834_v33 = vpack.c.bf16 %v1076_v20, %v1077_v21  ;;  %v1075_v58 = vsel %vm5988_vm0, %v1024_v63, %v1025_v37  ;;  %vm3591_vm8 = vcmp.ne.s32.totalorder %v685_v22, 0 }
  0x60   : > { %3272 = vmatprep.mubr.msk.bf16.mxu1 %vm4758_vm5, %v4753_v31  ;;  %v793_v44 = vrot.slane %v721_v23, 7  ;;  %v794_v45 = vrot.slane %v722_v27, 7  ;;  %v684_v63 = vand.u32 15, %v648_v48  ;;  %v687_v20 = vand.u32 15, %v651_v49 }
  0x61   : > { %3852 = vmatpush3.bf16.msra.mxu0 %v4317_v4  ;;  %vm3590_vm12 = vcmp.ne.s32.totalorder %v683_v15, 0  ;;  %v6103_v21 = vmov 0  ;;  %v1028_v25 = vrot.slane %v721_v23, 1  ;;  %v4330_v23 = vld [vmem:[#allocation2 + $0x1d8] sm:$0xff]  }
  0x62   : > { %3853 = vmatprep.subr.bf16.mxu0 %v4321_v28  ;;  %vm4842_vm2 = vmpackc.low %vm5990_vm3, %vm3590_vm12  ;;  %v836_v4 = vsel %vm5989_vm1, %v793_v44, %v794_v45  ;;  %v837_v15 = vsel %vm5989_vm1, %v792_v17, %v793_v44  ;;  %v6104_v21 = vsel %vm4875_vm11, 4294967295, %v6103_v21  ;;  %v1027_v17 = vrot.slane %v720_v50, 1  ;;  %v4884_v28 = vld [vmem:[%s4604_s22 + $0x40] sm:$0xff]  }
  0x63   : > { %v6102_v34 = vsel %vm4842_vm2, 4294967295, %v6101_v34  ;;  %v4879_v24 = vpack.c.bf16 %v836_v4, %v837_v15  ;;  %6105 = vst [vmem:[#allocation15_spill] sm:$0xff] %v4884_v28  ;;  %vm4887_vm12 = vmpackc.low %vm5990_vm3, %vm3591_vm8  ;;  %v650_v44 = vadd.s32 120, %v4560_v5  ;;  %v653_v50 = vadd.s32 144, %v4560_v5  ;;  %v4332_v4 = vld [vmem:[#allocation2 + $0x1d0] sm:$0xff]  }
  0x64   : > { %3196 = vmatmul.mubr.msk.bf16.gmra.mxu0 %vm4708_vm14, %v4705_v61  ;;  %v6107_v30 = vsel %vm4887_vm12, 4294967295, %v6106_v30  ;;  %vm4901_vm6 = vcmp.ne.s32.totalorder %v684_v63, 15  ;;  %vm4906_vm8 = vcmp.ne.s32.totalorder %v687_v20, 0  ;;  %v1072_v48 = vsel %vm5988_vm0, %v1027_v17, %v1028_v25 }
  0x65   : > { %1860 = vmatprep.mubr.bf16.mxu0 %v4663_v35  ;;  %v4319_v35 = vld [vmem:[#allocation2 + $0x1e8] sm:$0xff]   ;;  %3854 = vmatpush3.bf16.msra.mxu0 %v4323_v46  ;;  %v4329_v46 = vld [vmem:[#allocation2 + $0x100] sm:$0xff]   ;;  %v1073_v49 = vsel %vm5988_vm0, %v1026_v41, %v1027_v17  ;;  %v686_v63 = vand.u32 15, %v650_v44  ;;  %v1029_v20 = vrot.slane %v722_v27, 1  ;;  %v652_v41 = vadd.s32 136, %v4560_v5  ;;  %v4333_v17 = vld [vmem:[#allocation2 + $0x190] sm:$0xff]  }
  0x66   : > { %3276 = vmatmul.mubr.msk.bf16.gmra.mxu1 %vm4787_vm7, %v4791_v60  ;;  %3957 = vmatprep.subr.bf16.mxu1 %v4319_v35  ;;  %v724_v35 = vunpack.c.h.bf16 %v4839_v39  ;;  %v4926_v12 = vpack.c.bf16 %v1072_v48, %v1073_v49  ;;  %vm4934_vm0 = vmpackc.low %vm4901_vm6, %vm5990_vm3  ;;  %v689_v27 = vand.u32 15, %v653_v50  ;;  %v655_v48 = vadd.s32 160, %v4560_v5  ;;  %v4335_v50 = vld [vmem:[#allocation2 + $0x188] sm:$0xff]  }
  0x67   : > { %3280 = vmatprep.mubr.msk.bf16.mxu1 %vm4801_vm9, %v4798_v13  ;;  %3958 = vmatpush3.bf16.msra.mxu1 %v4320_v19  ;;  %v4872_v19 = vpack.c.bf16 %v1074_v54, %v1075_v58  ;;  %v725_v54 = vunpack.c.l.bf16 %v4884_v28  ;;  %v726_v58 = vunpack.c.h.bf16 %v4884_v28  ;;  %v688_v22 = vand.u32 15, %v652_v41 }
  0x68   : > { %3959 = vmatprep.subr.bf16.mxu1 %v4325_v47  ;;  %3855 = vmatprep.subr.bf16.mxu0 %v4327_v52  ;;  %v796_v37 = vrot.slane %v724_v35, 7  ;;  %v835_v52 = vsel %vm5989_vm1, %v794_v45, %v795_v36  ;;  %v6113_v45 = vmov 0  ;;  %vm6117_vm6 = vcmp.lt.s32.totalorder %v4560_v5, 7 }
  0x69   : > { %3856 = vmatpush3.bf16.msra.mxu0 %v4329_v46  ;;  %v1030_v46 = vrot.slane %v723_v16, 1  ;;  %v6114_v45 = vsel %vm4934_vm0, 4294967295, %v6113_v45  ;;  %v797_v44 = vrot.slane %v725_v54, 7  ;;  %v6115_v16 = vmov 0 }
  0x6a   : > { %v834_v15 = vsel %vm5989_vm1, %v795_v36, %v796_v37  ;;  %vm4943_vm1 = vmpackc.low %vm5990_vm3, %vm4906_vm8  ;;  %vm4958_vm3 = vcmp.ne.s32.totalorder %v686_v63, 15  ;;  %v728_v63 = vunpack.c.h.bf16 %v4929_v8  ;;  %v1031_v55 = vrot.slane %v724_v35, 1 }
  0x6b   : > { %3960 = vmatpush3.bf16.msra.mxu1 %v4326_v62  ;;  %v4331_v62 = vld [vmem:[#allocation2 + $0x198] sm:$0xff]   ;;  %v4938_v36 = vpack.c.bf16 %v834_v15, %v835_v52  ;;  %v6116_v16 = vsel %vm4943_vm1, 4294967295, %v6115_v16  ;;  %v1070_v47 = vsel %vm6117_vm6, %v1029_v20, %v1030_v46  ;;  %vm6118_vm8 = vmmov %vm6117_vm6  ;;  %v727_v15 = vunpack.c.l.bf16 %v4929_v8  ;;  %v4336_v52 = vld [vmem:[#allocation2 + $0x1c0] sm:$0xff]  }
  0x6c   : > { %3200 = vmatmul.mubr.msk.bf16.gmra.mxu0 %vm4758_vm5, %v4753_v31  ;;  %3961 = vmatprep.subr.bf16.mxu1 %v4330_v23  ;;  %v798_v23 = vrot.slane %v726_v58, 7  ;;  %v1071_v49 = vsel %vm6118_vm8, %v1028_v25, %v1029_v20  ;;  %vm4971_vm8 = vcmp.ne.s32.totalorder %v689_v27, 0  ;;  %v4977_v20 = vld [vmem:[%s4604_s22 + $0x50] sm:$0xff]   ;;  %v691_v9 = vand.u32 15, %v655_v48  ;;  %v4985_v27 = vld [vmem:[#allocation2 + $0x238] sm:$0xff]  }
  0x6d   : > { %1868 = vmatprep.mubr.bf16.mxu0 %v4715_v11  ;;  %6125 = vst [vmem:[#allocation17_spill] sm:$0xff] %v4977_v20  ;;  %v1032_v10 = vrot.slane %v725_v54, 1  ;;  %v799_v2 = vrot.slane %v727_v15, 7  ;;  %v6130_v35 = vmov 0  ;;  %v800_v54 = vrot.slane %v728_v63, 7  ;;  %4113 = vmatprep.subr.bf16.mxu0 %v4985_v27 }
  0x6e   : > { %3284 = vmatmul.mubr.msk.bf16.gmra.mxu1 %vm4830_vm15, %v4834_v33  ;;  %v1033_v48 = vrot.slane %v726_v58, 1  ;;  %v6135_v58 = vmov 0 }
  0x6f   : > { %3288 = vmatprep.mubr.msk.bf16.mxu1 %vm4842_vm2, %v4846_v40  ;;  %3962 = vmatpush3.bf16.msra.mxu1 %v4331_v62  ;;  %v4334_v62 = vld [vmem:[#allocation2 + $0x1c8] sm:$0xff]  }
  0x70   : > { %3963 = vmatprep.subr.bf16.mxu1 %v4332_v4  ;;  %v657_v4 = vadd.s32 176, %v4560_v5 }
  0x73   : > { %3964 = vmatpush3.bf16.msra.mxu1 %v4333_v17 }
  0x74   : > { %3204 = vmatmul.mubr.msk.bf16.gmra.mxu0 %vm4801_vm9, %v4798_v13  ;;  %3965 = vmatprep.subr.bf16.mxu1 %v4334_v62  ;;  %v654_v62 = vadd.s32 152, %v4560_v5  ;;  %vm3594_vm9 = vcmp.ne.s32.totalorder %v691_v9, 0 }
  0x75   : > { %1876 = vmatprep.mubr.bf16.mxu0 %v4751_v29 }
  0x76   : > { %3292 = vmatmul.mubr.msk.bf16.gmra.mxu1 %vm4875_vm11, %v4872_v19  ;;  %v690_v9 = vand.u32 15, %v654_v62 }
  0x77   : > { %3296 = vmatprep.mubr.msk.bf16.mxu1 %vm4887_vm12, %v4879_v24  ;;  %3966 = vmatpush3.bf16.msra.mxu1 %v4335_v50  ;;  %v6010_v50 = vunpack.c.h.bf16 %v4977_v20 }
  0x78   : > { %3967 = vmatprep.subr.bf16.mxu1 %v4336_v52 }
  0x7c   : > { %3208 = vmatmul.mubr.msk.bf16.gmra.mxu0 %vm4842_vm2, %v4846_v40  ;;  %vm4981_vm2 = vcmp.ne.s32.totalorder %v688_v22, 15  ;;  %v729_v22 = vunpack.c.l.bf16 %v4977_v20 }
  0x7d   : > { %1884 = vmatprep.mubr.bf16.mxu0 %v4796_v3 }
  0x7e   : > { %3300 = vmatmul.mubr.msk.bf16.gmra.mxu1 %vm4934_vm0, %v4926_v12 }
  0x7f   : > { %3304 = vmatprep.mubr.msk.bf16.mxu1 %vm4943_vm1, %v4938_v36 }
  0x84   : > { %3212 = vmatmul.mubr.msk.bf16.gmra.mxu0 %vm4887_vm12, %v4879_v24  ;;  %vm6121_vm12 = vcmp.lt.s32.totalorder %v4560_v5, 1 }
  0x85   : > { %1892 = vmatprep.mubr.bf16.mxu0 %v4839_v39  ;;  %v832_v41 = vsel %vm6121_vm12, %v797_v44, %v798_v23  ;;  %vm6122_vm6 = vmmov %vm6121_vm12  ;;  %vm6129_vm12 = vmmov 1  }
  0x86   : > { %v833_v17 = vsel %vm6122_vm6, %v796_v37, %v797_v44  ;;  %v4337_v37 = vld [vmem:[#allocation2 + $0x180] sm:$0xff]   ;;  %v4987_v44 = vpack.c.bf16 %v1070_v47, %v1071_v49  ;;  %vm4995_vm6 = vmpackc.low %vm4958_vm3, %vm6129_vm12  ;;  %v6132_v47 = vmov 0  ;;  %v1034_v49 = vrot.slane %v727_v15, 1 }
  0x87   : > { %v4989_v42 = vpack.c.bf16 %v832_v41, %v833_v17  ;;  %v6131_v35 = vsel %vm4995_vm6, 4294967295, %v6130_v35  ;;  %vm5005_vm0 = vmpackc.low %vm6129_vm12, %vm4971_vm8  ;;  %3968 = vmatpush3.bf16.msra.mxu1 %v4337_v37  ;;  %vm6137_vm8 = vcmp.lt.s32.totalorder %v4560_v5, 7  ;;  %v801_v41 = vrot.slane %v729_v22, 7 }
  0x88   : > { %v6133_v47 = vsel %vm5005_vm0, 4294967295, %v6132_v47  ;;  %3308 = vmatmul.mubr.msk.bf16.gmra.mxu1 %vm4995_vm6, %v4987_v44  ;;  %vm5018_vm3 = vmpackc.low %vm4981_vm2, %vm6129_vm12  ;;  %v1068_v15 = vsel %vm6137_vm8, %v1031_v55, %v1032_v10  ;;  %v802_v17 = vrot.slane %v6010_v50, 7  ;;  %vm6142_vm6 = vcmp.lt.s32.totalorder %v4560_v5, 1 }
  0x89   : > { %6128 = vst [vmem:[#allocation18_spill] sm:$0xff] %v4989_v42  ;;  %6134 = vst [vmem:[#allocation19_spill] sm:$0xff] %v6133_v47  ;;  %v6136_v58 = vsel %vm5018_vm3, 4294967295, %v6135_v58  ;;  %3312 = vmatprep.mubr.msk.bf16.mxu1 %vm5005_vm0, %v4989_v42  ;;  %v830_v25 = vsel %vm6142_vm6, %v799_v2, %v800_v54  ;;  %v659_v50 = vadd.s32 192, %v4560_v5  ;;  %v1036_v47 = vrot.slane %v729_v22, 1 }
  0x8a   : > { %vm5032_vm2 = vmpackc.low %vm6129_vm12, %vm3594_vm9 }
  0x8b   : > { %v6140_v1 = vsel %vm5032_vm2, 4294967295, %v6139_v1  ;;  %vm6143_vm11 = vmmov %vm6142_vm6 }
  0x8c   : > { %3216 = vmatmul.mubr.msk.bf16.gmra.mxu0 %vm4943_vm1, %v4938_v36  ;;  %vm6138_vm1 = vmmov %vm6137_vm8  ;;  %6141 = vst [vmem:[#allocation20_spill] sm:$0xff] %v6140_v1  ;;  %v831_v37 = vsel %vm6143_vm11, %v798_v23, %v799_v2  ;;  %vm3608_vm11 = vcmp.ne.s32.totalorder %v690_v9, 15  ;;  %v661_v1 = vadd.s32 208, %v4560_v5 }
  0x8d   : > { %1900 = vmatprep.mubr.bf16.mxu0 %v4884_v28  ;;  %v1069_v52 = vsel %vm6138_vm1, %v1030_v46, %v1031_v55  ;;  %v5047_v55 = vpack.c.bf16 %v830_v25, %v831_v37  ;;  %v693_v46 = vand.u32 15, %v657_v4  ;;  %v1066_v2 = vsel %vm6138_vm1, %v1033_v48, %v1034_v49  ;;  %vm6146_vm9 = vmmov %vm6138_vm1 }
  0x8e   : > { %v5042_v62 = vpack.c.bf16 %v1068_v15, %v1069_v52  ;;  %v1067_v23 = vsel %vm6146_vm9, %v1032_v10, %v1033_v48  ;;  %v656_v15 = vadd.s32 168, %v4560_v5  ;;  %v828_v4 = vsel %vm6142_vm6, %v801_v41, %v802_v17  ;;  %vm6147_vm8 = vmmov %vm6142_vm6 }
  0x8f   : > { %6145 = vst [vmem:[#allocation22_spill] sm:$0xff] %v5047_v55  ;;  %v829_v52 = vsel %vm6147_vm8, %v800_v54, %v801_v41  ;;  %v731_v25 = vunpack.c.l.bf16 %v5045_v6  ;;  %v732_v37 = vunpack.c.h.bf16 %v5045_v6  ;;  %v5071_v51 = vpack.c.bf16 %v1066_v2, %v1067_v23  ;;  %vm5074_vm1 = vmpackc.low %vm3608_vm11, %vm6129_vm12 }
  0x90   : > { %3316 = vmatmul.mubr.msk.bf16.gmra.mxu1 %vm5018_vm3, %v5042_v62  ;;  %v6149_v10 = vmov 0  ;;  %v5078_v48 = vpack.c.bf16 %v828_v4, %v829_v52  ;;  %v692_v9 = vand.u32 15, %v656_v15  ;;  %v6153_v54 = vmov 0 }
  0x91   : > { %3320 = vmatprep.mubr.msk.bf16.mxu1 %vm5032_vm2, %v5047_v55  ;;  %6148 = vst [vmem:[#allocation23_spill] sm:$0xff] %v5071_v51  ;;  %v6150_v10 = vsel %vm5074_vm1, 4294967295, %v6149_v10  ;;  %v803_v41 = vrot.slane %v731_v25, 7  ;;  %v695_v2 = vand.u32 15, %v659_v50  ;;  %v658_v23 = vadd.s32 184, %v4560_v5 }
  0x92   : > { %6151 = vst [vmem:[#allocation24_spill] sm:$0xff] %v6150_v10  ;;  %6152 = vst [vmem:[#allocation25_spill] sm:$0xff] %v5078_v48  ;;  %vm3609_vm6 = vcmp.ne.s32.totalorder %v692_v9, 15  ;;  %v6165_v28 = vunpack.c.h.bf16 %v4977_v20  ;;  %v6166_v10 = vmov 0 }
  0x93   : > { %v694_v9 = vand.u32 15, %v658_v23  ;;  %v660_v23 = vadd.s32 200, %v4560_v5 }
  0x94   : > { %3220 = vmatmul.mubr.msk.bf16.gmra.mxu0 %vm5005_vm0, %v4989_v42  ;;  %vm3595_vm0 = vcmp.ne.s32.totalorder %v693_v46, 0  ;;  %v804_v46 = vrot.slane %v732_v37, 7  ;;  %v5086_v42 = vld [vmem:[%s4604_s22 + $0x60] sm:$0xff]  }
  0x95   : > { %1908 = vmatprep.mubr.bf16.mxu0 %v4929_v8  ;;  %v1035_v8 = vrot.slane %v728_v63, 1  ;;  %vm5081_vm9 = vmpackc.low %vm6129_vm12, %vm3595_vm0  ;;  %6156 = vst [vmem:[#allocation27_spill] sm:$0xff] %v5086_v42  ;;  %vm6157_vm0 = vcmp.lt.s32.totalorder %v4560_v5, 7  ;;  %v733_v4 = vunpack.c.l.bf16 %v5086_v42  ;;  %v734_v52 = vunpack.c.h.bf16 %v5086_v42 }
  0x96   : > { %v6154_v54 = vsel %vm5081_vm9, 4294967295, %v6153_v54  ;;  %vm6158_vm11 = vmmov %vm6157_vm0  ;;  %v826_v50 = vsel %vm6147_vm8, %v803_v41, %v804_v46 }
  0x97   : > { %6155 = vst [vmem:[#allocation26_spill] sm:$0xff] %v6154_v54  ;;  %v1064_v63 = vsel %vm6157_vm0, %v1035_v8, %v1036_v47  ;;  %v1065_v22 = vsel %vm6158_vm11, %v1034_v49, %v1035_v8  ;;  %vm5113_vm0 = vmpackc.low %vm3609_vm6, %vm6129_vm12  ;;  %v6161_v8 = vmov 0  ;;  %vm3610_vm6 = vcmp.ne.s32.totalorder %v694_v9, 15 }
  0x98   : > { %3324 = vmatmul.mubr.msk.bf16.gmra.mxu1 %vm5074_vm1, %v5071_v51  ;;  %vm3596_vm1 = vcmp.ne.s32.totalorder %v695_v2, 0  ;;  %v6162_v8 = vsel %vm5113_vm0, 4294967295, %v6161_v8  ;;  %v805_v2 = vrot.slane %v733_v4, 7  ;;  %v5166_v51 = vld [vmem:[%s4604_s22 + $0x70] sm:$0xff]   ;;  %v6214_v0 = vld [vmem:[#allocation23_spill] sm:$0xff] }
  0x99   : > { %3328 = vmatprep.mubr.msk.bf16.mxu1 %vm5081_vm9, %v5078_v48  ;;  %6163 = vst [vmem:[#allocation29_spill] sm:$0xff] %v6162_v8  ;;  %v1039_v8 = vrot.slane %v732_v37, 1 }
  0x9c   : > { %3224 = vmatmul.mubr.msk.bf16.gmra.mxu0 %vm5032_vm2, %v5047_v55  ;;  %vm6159_vm2 = vmmov %vm6147_vm8  ;;  %v5110_v55 = vpack.c.bf16 %v1064_v63, %v1065_v22  ;;  %v806_v63 = vrot.slane %v734_v52, 7  ;;  %v5127_v22 = vld [vmem:[%s4604_s22 + $0x68] sm:$0xff]  }
  0x9d   : > { %1916 = vmatprep.mubr.bf16.mxu0 %v4977_v20  ;;  %v827_v15 = vsel %vm6159_vm2, %v802_v17, %v803_v41  ;;  %v1037_v17 = vrot.slane %v6165_v28, 1  ;;  %v1038_v41 = vrot.slane %v731_v25, 1  ;;  %vm5122_vm2 = vmpackc.low %vm6129_vm12, %vm3596_vm1  ;;  %6169 = vst [vmem:[#allocation32_spill] sm:$0xff] %v5127_v22  ;;  %v736_v54 = vunpack.c.h.bf16 %v5127_v22 }
  0x9e   : > { %6160 = vst [vmem:[#allocation28_spill] sm:$0xff] %v5110_v55  ;;  %v5117_v49 = vpack.c.bf16 %v826_v50, %v827_v15  ;;  %v6167_v10 = vsel %vm5122_vm2, 4294967295, %v6166_v10  ;;  %v697_v50 = vand.u32 15, %v661_v1  ;;  %vm6170_vm1 = vmmov %vm6158_vm11  ;;  %v824_v1 = vsel %vm6147_vm8, %v805_v2, %v806_v63 }
  0x9f   : > { %6168 = vst [vmem:[#allocation31_spill] sm:$0xff] %v6167_v10  ;;  %v1062_v28 = vsel %vm6170_vm1, %v1037_v17, %v1038_v41  ;;  %vm6171_vm11 = vmmov %vm6170_vm1 }
  0xa0   : > { %6164 = vst [vmem:[#allocation30_spill] sm:$0xff] %v5117_v49  ;;  %3332 = vmatmul.mubr.msk.bf16.gmra.mxu1 %vm5113_vm0, %v5110_v55  ;;  %v1063_v25 = vsel %vm6171_vm11, %v1036_v47, %v1037_v17  ;;  %vm3597_vm0 = vcmp.ne.s32.totalorder %v697_v50, 0  ;;  %vm5154_vm1 = vmpackc.low %vm3610_vm6, %vm6129_vm12  ;;  %v6173_v47 = vmov 0  ;;  %v696_v17 = vand.u32 15, %v660_v23 }
  0xa1   : > { %3336 = vmatprep.mubr.msk.bf16.mxu1 %vm5122_vm2, %v5117_v49  ;;  %v5151_v20 = vpack.c.bf16 %v1062_v28, %v1063_v25  ;;  %v6174_v47 = vsel %vm5154_vm1, 4294967295, %v6173_v47  ;;  %v1040_v55 = vrot.slane %v733_v4, 1  ;;  %v808_v50 = vrot.slane %v736_v54, 7 }
  0xa2   : > { %6175 = vst [vmem:[#allocation33_spill] sm:$0xff] %v6174_v47  ;;  %vm3611_vm6 = vcmp.ne.s32.totalorder %v696_v17, 15  ;;  %v662_v25 = vadd.s32 216, %v4560_v5  ;;  %v1041_v17 = vrot.slane %v734_v52, 1 }
  0xa4   : > { %3228 = vmatmul.mubr.msk.bf16.gmra.mxu0 %vm5081_vm9, %v5078_v48  ;;  %vm6172_vm9 = vmmov %vm6147_vm8  ;;  %v663_v48 = vadd.s32 224, %v4560_v5 }
  0xa5   : > { %1924 = vmatprep.mubr.bf16.mxu0 %v5045_v6  ;;  %v825_v15 = vsel %vm6172_vm9, %v804_v46, %v805_v2  ;;  %v735_v6 = vunpack.c.l.bf16 %v5127_v22  ;;  %vm5161_vm9 = vmpackc.low %vm6129_vm12, %vm3597_vm0  ;;  %v6177_v46 = vmov 0 }
  0xa6   : > { %v5158_v9 = vpack.c.bf16 %v824_v1, %v825_v15  ;;  %v6178_v46 = vsel %vm5161_vm9, 4294967295, %v6177_v46  ;;  %v699_v28 = vand.u32 15, %v663_v48  ;;  %vm6180_vm0 = vmmov %vm6171_vm11  ;;  %v737_v1 = vunpack.c.l.bf16 %v5166_v51 }
  0xa7   : > { %6179 = vst [vmem:[#allocation35_spill] sm:$0xff] %v6178_v46  ;;  %v807_v2 = vrot.slane %v735_v6, 7  ;;  %v1060_v37 = vsel %vm6180_vm0, %v1039_v8, %v1040_v55  ;;  %vm6181_vm11 = vmmov %vm6180_vm0  ;;  %v738_v15 = vunpack.c.h.bf16 %v5166_v51 }
  0xa8   : > { %6176 = vst [vmem:[#allocation34_spill] sm:$0xff] %v5158_v9  ;;  %3340 = vmatmul.mubr.msk.bf16.gmra.mxu1 %vm5154_vm1, %v5151_v20  ;;  %v1061_v4 = vsel %vm6181_vm11, %v1038_v41, %v1039_v8  ;;  %vm3598_vm1 = vcmp.ne.s32.totalorder %v699_v28, 0  ;;  %vm5193_vm0 = vmpackc.low %vm3611_vm6, %vm6129_vm12  ;;  %v6183_v8 = vmov 0  ;;  %v809_v28 = vrot.slane %v737_v1, 7 }
  0xa9   : > { %3344 = vmatprep.mubr.msk.bf16.mxu1 %vm5161_vm9, %v5158_v9  ;;  %v822_v48 = vsel %vm6147_vm8, %v807_v2, %v808_v50  ;;  %v5190_v10 = vpack.c.bf16 %v1060_v37, %v1061_v4  ;;  %v6184_v8 = vsel %vm5193_vm0, 4294967295, %v6183_v8  ;;  %v810_v47 = vrot.slane %v738_v15, 7  ;;  %v5219_v4 = vld [vmem:[%s4604_s22 + $0x78] sm:$0xff]  }
  0xaa   : > { %6189 = vst [vmem:[#allocation36_spill] sm:$0xff] %v5219_v4 }
  0xac   : > { %3232 = vmatmul.mubr.msk.bf16.gmra.mxu0 %vm5122_vm2, %v5117_v49  ;;  %vm6182_vm2 = vmmov %vm6147_vm8  ;;  %v1042_v49 = vrot.slane %v735_v6, 1 }
  0xad   : > { %1932 = vmatprep.mubr.bf16.mxu0 %v5086_v42  ;;  %v823_v23 = vsel %vm6182_vm2, %v806_v63, %v807_v2  ;;  %v665_v42 = vadd.s32 240, %v4560_v5  ;;  %vm5200_vm2 = vmpackc.low %vm6129_vm12, %vm3598_vm1  ;;  %v6185_v63 = vmov 0  ;;  %v698_v2 = vand.u32 15, %v662_v25 }
  0xae   : > { %v5197_v41 = vpack.c.bf16 %v822_v48, %v823_v23  ;;  %v6186_v63 = vsel %vm5200_vm2, 4294967295, %v6185_v63  ;;  %vm6187_vm1 = vmmov %vm6181_vm11  ;;  %v820_v25 = vsel %vm6147_vm8, %v809_v28, %v810_v47  ;;  %v664_v23 = vadd.s32 232, %v4560_v5 }
  0xaf   : > { %v701_v37 = vand.u32 15, %v665_v42  ;;  %v1058_v6 = vsel %vm6187_vm1, %v1041_v17, %v1042_v49  ;;  %vm6188_vm11 = vmmov %vm6187_vm1  ;;  %v739_v42 = vunpack.c.l.bf16 %v5219_v4  ;;  %vm3612_vm6 = vcmp.ne.s32.totalorder %v698_v2, 15 }
  0xb0   : > { %3348 = vmatmul.mubr.msk.bf16.gmra.mxu1 %vm5193_vm0, %v5190_v10  ;;  %v1059_v52 = vsel %vm6188_vm11, %v1040_v55, %v1041_v17  ;;  %vm5231_vm1 = vmpackc.low %vm3612_vm6, %vm6129_vm12  ;;  %v6191_v55 = vmov 0  ;;  %v1043_v2 = vrot.slane %v736_v54, 1  ;;  %v1044_v4 = vrot.slane %v737_v1, 1 }
  0xb1   : > { %3352 = vmatprep.mubr.msk.bf16.mxu1 %vm5200_vm2, %v5197_v41  ;;  %vm3599_vm0 = vcmp.ne.s32.totalorder %v701_v37, 0  ;;  %v5228_v46 = vpack.c.bf16 %v1058_v6, %v1059_v52  ;;  %v6192_v55 = vsel %vm5231_vm1, 4294967295, %v6191_v55  ;;  %v666_v52 = vadd.s32 248, %v4560_v5 }
  0xb2   : > { %vm5238_vm11 = vmpackc.low %vm6129_vm12, %vm3599_vm0 }
  0xb4   : > { %3236 = vmatmul.mubr.msk.bf16.gmra.mxu0 %vm5161_vm9, %v5158_v9  ;;  %vm6190_vm9 = vmmov %vm6147_vm8  ;;  %v4348_v9 = vld [vmem:[#allocation4 + $0x28] sm:$0xff]  }
  0xb5   : > { %1940 = vmatprep.mubr.bf16.mxu0 %v5127_v22  ;;  %v821_v48 = vsel %vm6190_vm9, %v808_v50, %v809_v28  ;;  %v667_v22 = vadd.s32 256, %v4560_v5  ;;  %v700_v50 = vand.u32 15, %v664_v23  ;;  %v811_v28 = vrot.slane %v739_v42, 7 }
  0xb6   : > { %v5235_v17 = vpack.c.bf16 %v820_v25, %v821_v48  ;;  %vm6195_vm9 = vcmp.lt.s32.totalorder %v4560_v5, 7  ;;  %v6198_v48 = vmov 0  ;;  %v1045_v23 = vrot.slane %v738_v15, 1 }
  0xb7   : > { %v703_v37 = vand.u32 15, %v667_v22  ;;  %v1056_v54 = vsel %vm6195_vm9, %v1043_v2, %v1044_v4  ;;  %vm6196_vm0 = vmmov %vm6195_vm9  ;;  %vm3613_vm6 = vcmp.ne.s32.totalorder %v700_v50, 15  ;;  %v818_v22 = vsel %vm6147_vm8, %v811_v28, %v4616_v59 }
  0xb8   : > { %3356 = vmatmul.mubr.msk.bf16.gmra.mxu1 %vm5231_vm1, %v5228_v46  ;;  %v1057_v1 = vsel %vm6196_vm0, %v1042_v49, %v1043_v2  ;;  %vm5265_vm3 = vmpackc.low %vm3613_vm6, %vm6129_vm12  ;;  %v5271_v2 = vrot.slane %v739_v42, 1 }
  0xb9   : > { %3360 = vmatprep.mubr.msk.bf16.mxu1 %vm5238_vm11, %v5235_v17  ;;  %vm3614_vm1 = vcmp.ne.s32.totalorder %v703_v37, 0  ;;  %v5262_v25 = vpack.c.bf16 %v1056_v54, %v1057_v1  ;;  %v6199_v48 = vsel %vm5265_vm3, 4294967295, %v6198_v48  ;;  %v4356_v37 = vld [vmem:[%s4604_s22 + $0x8] sm:$0xff]   ;;  %v4341_v54 = vld [vmem:[#allocation2 + $0x220] sm:$0xff]   ;;  %v4342_v1 = vld [vmem:[#allocation2 + $0x218] sm:$0xff]  }
  0xba   : > { %vm5274_vm9 = vmpackc.low %vm6129_vm12, %vm3614_vm1 }
  0xbb   : > { %vm6203_vm1 = vmmov %vm6196_vm0 }
  0xbc   : > { %3240 = vmatmul.mubr.msk.bf16.gmra.mxu0 %vm5200_vm2, %v5197_v41  ;;  %vm6197_vm2 = vmmov %vm6147_vm8  ;;  %v1055_v42 = vsel %vm6203_vm1, %v1044_v4, %v1045_v23  ;;  %v4340_v4 = vld [vmem:[#allocation2 + $0x228] sm:$0xff]   ;;  %vm6210_vm8 = vnez %v6131_v35  ;;  %vm6212_vm1 = vnez %v6136_v58 }
  0xbd   : > { %1948 = vmatprep.mubr.bf16.mxu0 %v5166_v51  ;;  %v819_v6 = vsel %vm6197_vm2, %v810_v47, %v811_v28  ;;  %v702_v47 = vand.u32 15, %v666_v52  ;;  %vm6202_vm2 = vmmov %vm6196_vm0  ;;  %v6204_v28 = vmov 0 }
  0xbe   : > { %v5269_v49 = vpack.c.bf16 %v818_v22, %v819_v6  ;;  %v1054_v15 = vsel %vm6202_vm2, %v1045_v23, %v5271_v2  ;;  %v4343_v22 = vld [vmem:[#allocation2 + $0x210] sm:$0xff]   ;;  %v4345_v6 = vld [vmem:[#allocation2 + $0x200] sm:$0xff]   ;;  %vm6211_vm2 = vnez %v6107_v30 }
  0xbf   : > { %vm3615_vm0 = vcmp.ne.s32.totalorder %v702_v47, 15  ;;  %v5295_v50 = vpack.c.bf16 %v1054_v15, %v1055_v42  ;;  %v6225_v47 = vld [vmem:[#allocation22_spill] sm:$0xff]  ;;  %v6226_v15 = vld [vmem:[#allocation20_spill] sm:$0xff]  ;;  %v6228_v42 = vld [vmem:[#allocation33_spill] sm:$0xff] }
  0xc0   : > { %3364 = vmatmul.mubr.msk.bf16.gmra.mxu1 %vm5265_vm3, %v5262_v25  ;;  %vm5298_vm6 = vmpackc.low %vm3615_vm0, %vm6129_vm12  ;;  %vm6213_vm0 = vnez %v6116_v16  ;;  %v5375_v16 = vld [vmem:[%s5984_s4] ss:$0 sm:$0xff] }
  0xc1   : > { %3368 = vmatprep.mubr.msk.bf16.mxu1 %vm5274_vm9, %v5269_v49  ;;  %v6205_v28 = vsel %vm5298_vm6, 4294967295, %v6204_v28 }
  0xc4   : > { %3244 = vmatmul.mubr.msk.bf16.gmra.mxu0 %vm5238_vm11, %v5235_v17 }
  0xc5   : > { %3376 = vmatprep.mubr.msk.bf16.mxu0 %vm4699_vm13, %v4703_v57  ;;  %v4355_v57 = vld [vmem:[%s4604_s22] sm:$0xff]   ;;  %vm6207_vm13 = vnez %v6098_v14 }
  0xc8   : > { %3372 = vmatmul.mubr.msk.bf16.gmra.mxu1 %vm5298_vm6, %v5295_v50 }
  0xc9   : > { %2311 = vmatprep.mubr.bf16.mxu1 %v4356_v37 }
  0xcc   : > { %2151 = vmatmul.mubr.bf16.vlgmr.msra.gmra.mxu0 %v4355_v57  ;;  %v6230_v57 = vld [vmem:[#allocation17_spill] sm:$0xff] }
  0xcd   : > { %4114 = vmatpush3.bf16.msra.mxu0 %v4985_v27  ;;  %3380 = vmatprep.mubr.msk.bf16.mxu0 %vm4737_vm4, %v4748_v26  ;;  %v4357_v27 = vld [vmem:[%s4604_s22 + $0x10] sm:$0xff]  }
  0xce   : > { %4115 = vmatprep.subr.bf16.mxu0 %v4339_v56 }
  0xd0   : > { %3440 = vmatmul.mubr.msk.bf16.vlgmr.msra.gmra.mxu1 %vm4676_vm10, %v4683_v43  ;;  %v4344_v43 = vld [vmem:[#allocation2 + $0x208] sm:$0xff]   ;;  %vm6206_vm10 = vnez %v6104_v21 }
  0xd1   : > { %4116 = vmatpush3.bf16.msra.mxu0 %v4339_v56  ;;  %2319 = vmatprep.mubr.bf16.mxu1 %v4357_v27 }
  0xd2   : > { %4117 = vmatprep.subr.bf16.mxu0 %v4340_v4 }
  0xd4   : > { %2159 = vmatmul.mubr.bf16.gmra.mxu0 %v4356_v37 }
  0xd5   : > { %3384 = vmatprep.mubr.msk.bf16.mxu0 %vm4787_vm7, %v4791_v60  ;;  %4118 = vmatpush3.bf16.msra.mxu0 %v4340_v4 }
  0xd6   : > { %4119 = vmatprep.subr.bf16.mxu0 %v4341_v54 }
  0xd8   : > { %3444 = vmatmul.mubr.msk.bf16.gmra.mxu1 %vm4708_vm14, %v4705_v61  ;;  %v4359_v61 = vld [vmem:[%s4604_s22 + $0x20] sm:$0xff]   ;;  %vm6208_vm14 = vnez %v6114_v45 }
  0xd9   : > { %4120 = vmatpush3.bf16.msra.mxu0 %v4341_v54  ;;  %2327 = vmatprep.mubr.bf16.mxu1 %v4358_v38 }
  0xda   : > { %4121 = vmatprep.subr.bf16.mxu0 %v4342_v1 }
  0xdc   : > { %2167 = vmatmul.mubr.bf16.gmra.mxu0 %v4357_v27 }
  0xdd   : > { %3388 = vmatprep.mubr.msk.bf16.mxu0 %vm4830_vm15, %v4834_v33  ;;  %4122 = vmatpush3.bf16.msra.mxu0 %v4342_v1 }
  0xde   : > { %4123 = vmatprep.subr.bf16.mxu0 %v4343_v22 }
  0xe0   : > { %3448 = vmatmul.mubr.msk.bf16.gmra.mxu1 %vm4758_vm5, %v4753_v31  ;;  %vm6209_vm5 = vnez %v6102_v34  ;;  %v6222_v34 = vld [vmem:[#allocation29_spill] sm:$0xff] }
  0xe1   : > { %4124 = vmatpush3.bf16.msra.mxu0 %v4343_v22  ;;  %2335 = vmatprep.mubr.bf16.mxu1 %v4715_v11  ;;  %v6215_v11 = vld [vmem:[#allocation24_spill] sm:$0xff] }
  0xe2   : > { %4125 = vmatprep.subr.bf16.mxu0 %v4344_v43 }
  0xe4   : > { %2175 = vmatmul.mubr.bf16.gmra.mxu0 %v4358_v38 }
  0xe5   : > { %3392 = vmatprep.mubr.msk.bf16.mxu0 %vm6206_vm10, %v4872_v19  ;;  %4126 = vmatpush3.bf16.msra.mxu0 %v4344_v43 }
  0xe6   : > { %4127 = vmatprep.subr.bf16.mxu0 %v4345_v6 }
  0xe8   : > { %3452 = vmatmul.mubr.msk.bf16.gmra.mxu1 %vm6207_vm13, %v4798_v13  ;;  %vm6216_vm13 = vnez %v6215_v11  ;;  %v6219_v13 = vld [vmem:[#allocation19_spill] sm:$0xff] }
  0xe9   : > { %4128 = vmatpush3.bf16.msra.mxu0 %v4345_v6  ;;  %2343 = vmatprep.mubr.bf16.mxu1 %v4751_v29 }
  0xec   : > { %2183 = vmatmul.mubr.bf16.gmra.mxu0 %v4359_v61 }
  0xed   : > { %3396 = vmatprep.mubr.msk.bf16.mxu0 %vm6208_vm14, %v4926_v12 }
  0xf0   : > { %3456 = vmatmul.mubr.msk.bf16.gmra.mxu1 %vm6209_vm5, %v4846_v40  ;;  %vm6220_vm5 = vnez %v6219_v13  ;;  %v6224_v40 = vld [vmem:[#allocation16_spill] sm:$0xff]  ;;  %v6231_v13 = vld [vmem:[#allocation25_spill] sm:$0xff] }
  0xf1   : > { %2351 = vmatprep.mubr.bf16.mxu1 %v4796_v3 }
  0xf4   : > { %2191 = vmatmul.mubr.bf16.gmra.mxu0 %v4751_v29  ;;  %v6217_v29 = vld [vmem:[#allocation15_spill] sm:$0xff] }
  0xf5   : > { %3400 = vmatprep.mubr.msk.bf16.mxu0 %vm6210_vm8, %v4987_v44 }
  0xf8   : > { %3460 = vmatmul.mubr.msk.bf16.gmra.mxu1 %vm6211_vm2, %v4879_v24  ;;  %vm6223_vm2 = vnez %v6222_v34 }
  0xf9   : > { %2359 = vmatprep.mubr.bf16.mxu1 %v4839_v39 }
  0xfc   : > { %2199 = vmatmul.mubr.bf16.gmra.mxu0 %v4796_v3  ;;  %v6218_v3 = vld [vmem:[#allocation18_spill] sm:$0xff] }
  0xfd   : > { %3404 = vmatprep.mubr.msk.bf16.mxu0 %vm6212_vm1, %v5042_v62 }
 0x100   : > { %3464 = vmatmul.mubr.msk.bf16.gmra.mxu1 %vm6213_vm0, %v4938_v36  ;;  %vm6227_vm0 = vnez %v6226_v15 }
 0x101   : > { %2367 = vmatprep.mubr.bf16.mxu1 %v6217_v29 }
 0x104   : > { %2207 = vmatmul.mubr.bf16.gmra.mxu0 %v4839_v39  ;;  %v6221_v39 = vld [vmem:[#allocation28_spill] sm:$0xff] }
 0x105   : > { %3408 = vmatprep.mubr.msk.bf16.mxu0 %vm6216_vm13, %v6214_v0 }
 0x108   : > { %3468 = vmatmul.mubr.msk.bf16.gmra.mxu1 %vm6220_vm5, %v6218_v3  ;;  %vm6229_vm5 = vnez %v6228_v42 }
 0x109   : > { %2375 = vmatprep.mubr.bf16.mxu1 %v6224_v40 }
 0x10c   : > { %v3633_v31 = vpop.f32.mrf.mxu0  ;;  %2215 = vmatmul.mubr.bf16.gmra.mxu0 %v6217_v29 }
 0x10d   : > { %3412 = vmatprep.mubr.msk.bf16.mxu0 %vm6223_vm2, %v6221_v39 }
 0x10e   : > { %v3634_v7 = vpop.f32.mrf.mxu0  ;;  %v3745_v23 = vpop.f32.mrf.mxu1 }
 0x10f   : > { %v3635_v14 = vadd.f32 %v3634_v7, %v3633_v31 }
 0x110   : > { %v3636_v24 = vpop.f32.mrf.mxu0  ;;  %3472 = vmatmul.mubr.msk.bf16.gmra.mxu1 %vm6227_vm0, %v6225_v47  ;;  %v3746_v4 = vpop.f32.mrf.mxu1 }
 0x111   : > { %v1831_v56 = vadd.f32 %v3635_v14, %v5375_v16  ;;  %2383 = vmatprep.mubr.bf16.mxu1 %v6230_v57  ;;  %v3747_v27 = vadd.f32 %v3746_v4, %v3745_v23  ;;  %v6232_v14 = vld [vmem:[#allocation26_spill] sm:$0xff] }
 0x112   : > { %v3637_v30 = vpop.f32.mrf.mxu0  ;;  %v3748_v22 = vpop.f32.mrf.mxu1  ;;  %vm6233_vm0 = vnez %v6232_v14 }
 0x113   : > { %v3638_v36 = vadd.f32 %v3637_v30, %v3636_v24  ;;  %v5386_v38 = vadd.f32 %v3747_v27, %v1831_v56  ;;  %v6235_v30 = vld [vmem:[#allocation21_spill] sm:$0xff] }
 0x114   : > { %v3639_v52 = vpop.f32.mrf.mxu0  ;;  %2223 = vmatmul.mubr.bf16.gmra.mxu0 %v6224_v40  ;;  %v3749_v61 = vpop.f32.mrf.mxu1 }
 0x115   : > { %3416 = vmatprep.mubr.msk.bf16.mxu0 %vm6229_vm5, %v5151_v20  ;;  %v1834_v43 = vadd.f32 %v3638_v36, %v5375_v16  ;;  %v3750_v31 = vadd.f32 %v3749_v61, %v3748_v22  ;;  %vm6234_vm5 = vnez %v6184_v8  ;;  %v6236_v61 = vld [vmem:[#allocation30_spill] sm:$0xff] }
 0x116   : > { %v3640_v37 = vpop.f32.mrf.mxu0  ;;  %v3751_v3 = vpop.f32.mrf.mxu1 }
 0x117   : > { %v3641_v54 = vadd.f32 %v3640_v37, %v3639_v52  ;;  %v5396_v40 = vadd.f32 %v3750_v31, %v1834_v43  ;;  %v6237_v31 = vld [vmem:[#allocation31_spill] sm:$0xff] }
 0x118   : > { %v3642_v1 = vpop.f32.mrf.mxu0  ;;  %3476 = vmatmul.mubr.msk.bf16.gmra.mxu1 %vm6233_vm0, %v6231_v13  ;;  %v3752_v52 = vpop.f32.mrf.mxu1  ;;  %vm6238_vm0 = vnez %v6237_v31 }
 0x119   : > { %v1839_v24 = vadd.f32 %v3641_v54, %v5375_v16  ;;  %2391 = vmatprep.mubr.bf16.mxu1 %v6235_v30  ;;  %v3753_v47 = vadd.f32 %v3752_v52, %v3751_v3  ;;  %v6241_v3 = vld [vmem:[#allocation27_spill] sm:$0xff] }
 0x11a   : > { %v3643_v6 = vpop.f32.mrf.mxu0  ;;  %v3754_v56 = vpop.f32.mrf.mxu1 }
 0x11b   : > { %v3644_v29 = vadd.f32 %v3643_v6, %v3642_v1  ;;  %v5400_v37 = vadd.f32 %v3753_v47, %v1839_v24 }
 0x11c   : > { %v3645_v7 = vpop.f32.mrf.mxu0  ;;  %2231 = vmatmul.mubr.bf16.gmra.mxu0 %v6230_v57  ;;  %v4346_v57 = vld [vmem:[#allocation4 + $0x38] sm:$0xff]   ;;  %v3755_v1 = vpop.f32.mrf.mxu1 }
 0x11d   : > { %3420 = vmatprep.mubr.msk.bf16.mxu0 %vm6234_vm5, %v5190_v10  ;;  %v1842_v4 = vadd.f32 %v3644_v29, %v5375_v16  ;;  %4161 = vmatprep.subr.bf16.mxu1 %v4346_v57  ;;  %v3756_v43 = vadd.f32 %v3755_v1, %v3754_v56  ;;  %vm6239_vm5 = vnez %v6192_v55 }
 0x11e   : > { %v3646_v36 = vpop.f32.mrf.mxu0  ;;  %4162 = vmatpush3.bf16.msra.mxu1 %v4346_v57  ;;  %v3757_v54 = vpop.f32.mrf.mxu1 }
 0x11f   : > { %v3647_v23 = vadd.f32 %v3646_v36, %v3645_v7  ;;  %v5410_v7 = vadd.f32 %v3756_v43, %v1842_v4  ;;  %v6243_v43 = vld [vmem:[#allocation34_spill] sm:$0xff] }
 0x120   : > { %v3648_v15 = vpop.f32.mrf.mxu0  ;;  %3480 = vmatmul.mubr.msk.bf16.gmra.mxu1 %vm6238_vm0, %v6236_v61  ;;  %v3758_v14 = vpop.f32.mrf.mxu1  ;;  %v6244_v61 = vld [vmem:[#allocation35_spill] sm:$0xff] }
 0x121   : > { %6240 = vst [vmem:[#allocation23_spill] sm:$0xff] %v5410_v7  ;;  %v1847_v29 = vadd.f32 %v3647_v23, %v5375_v16  ;;  %2399 = vmatprep.mubr.bf16.mxu1 %v6241_v3  ;;  %vm6245_vm0 = vnez %v6244_v61 }
 0x122   : > { %v3649_v27 = vpop.f32.mrf.mxu0  ;;  %v3760_v52 = vpop.f32.mrf.mxu1 }
 0x123   : > { %v3650_v22 = vadd.f32 %v3649_v27, %v3648_v15 }
 0x124   : > { %v3651_v6 = vpop.f32.mrf.mxu0  ;;  %2239 = vmatmul.mubr.bf16.gmra.mxu0 %v6235_v30  ;;  %v3759_v30 = vadd.f32 %v3758_v14, %v3757_v54  ;;  %v3761_v57 = vpop.f32.mrf.mxu1  ;;  %v6247_v54 = vld [vmem:[#allocation32_spill] sm:$0xff] }
 0x125   : > { %3424 = vmatprep.mubr.msk.bf16.mxu0 %vm6239_vm5, %v5228_v46  ;;  %v1850_v15 = vadd.f32 %v3650_v22, %v5375_v16  ;;  %v3762_v1 = vadd.f32 %v3761_v57, %v3760_v52  ;;  %v4347_v52 = vld [vmem:[#allocation4 + $0x30] sm:$0xff]  }
 0x126   : > { %v3652_v13 = vpop.f32.mrf.mxu0  ;;  %v5414_v47 = vadd.f32 %v3759_v30, %v1847_v29  ;;  %v3763_v23 = vpop.f32.mrf.mxu1  ;;  %4163 = vmatprep.subr.bf16.mxu1 %v4347_v52 }
 0x127   : > { %v3653_v24 = vadd.f32 %v3652_v13, %v3651_v6  ;;  %v5424_v6 = vadd.f32 %v3762_v1, %v1850_v15  ;;  %v6248_v15 = vld [vmem:[#allocation13_spill] sm:$0xff]  ;;  %4164 = vmatpush3.bf16.msra.mxu1 %v4347_v52 }
 0x128   : > { %v3654_v36 = vpop.f32.mrf.mxu0  ;;  %6242 = vst [vmem:[#allocation24_spill] sm:$0xff] %v5414_v47  ;;  %3484 = vmatmul.mubr.msk.bf16.gmra.mxu1 %vm6245_vm0, %v6243_v43  ;;  %v3764_v29 = vpop.f32.mrf.mxu1  ;;  %v6249_v1 = vunpack.c.h.bf16 %v6248_v15  ;;  %vm6250_vm0 = vnez %v6186_v63  ;;  %4165 = vmatprep.subr.bf16.mxu1 %v4348_v9 }
 0x129   : > { %6246 = vst [vmem:[#allocation15_spill] sm:$0xff] %v5424_v6  ;;  %v1855_v22 = vadd.f32 %v3653_v24, %v5375_v16  ;;  %2407 = vmatprep.mubr.bf16.mxu1 %v6247_v54  ;;  %v3765_v14 = vadd.f32 %v3764_v29, %v3763_v23  ;;  %v6251_v29 = vld [vmem:[#allocation9_spill] sm:$0xff] }
 0x12a   : > { %v3655_v56 = vpop.f32.mrf.mxu0  ;;  %v1047_v61 = vrot.slane %v6249_v1, 1 }
 0x12b   : > { %v3656_v27 = vadd.f32 %v3655_v56, %v3654_v36  ;;  %v3766_v36 = vpop.f32.mrf.mxu1  ;;  %v5429_v56 = vadd.f32 %v3765_v14, %v1855_v22  ;;  %4166 = vmatpush3.bf16.msra.mxu1 %v4348_v9  ;;  %v6258_v9 = vld [vmem:[#allocation12_spill] sm:$0xff] }
 0x12c   : > { %v3657_v4 = vpop.f32.mrf.mxu0  ;;  %2247 = vmatmul.mubr.bf16.gmra.mxu0 %v6241_v3  ;;  %v668_v3 = vadd.s32 264, %v4560_v5 }
 0x12d   : > { %3428 = vmatprep.mubr.msk.bf16.mxu0 %vm5265_vm3, %v5262_v25  ;;  %v1858_v57 = vadd.f32 %v3656_v27, %v5375_v16  ;;  %v3767_v24 = vpop.f32.mrf.mxu1  ;;  %vm6252_vm3 = vcmp.lt.s32.totalorder %v4560_v5, 7 }
 0x12e   : > { %v3658_v31 = vpop.f32.mrf.mxu0  ;;  %v704_v47 = vand.u32 15, %v668_v3  ;;  %v3768_v7 = vadd.f32 %v3767_v24, %v3766_v36  ;;  %vm6253_vm5 = vmmov %vm6252_vm3 }
 0x12f   : > { %v3659_v13 = vadd.f32 %v3658_v31, %v3657_v4  ;;  %v3769_v23 = vpop.f32.mrf.mxu1  ;;  %v1053_v63 = vsel %vm6253_vm5, %v5271_v2, %v1047_v61 }
 0x130   : > { %v3660_v30 = vpop.f32.mrf.mxu0  ;;  %3488 = vmatmul.mubr.msk.bf16.gmra.mxu1 %vm6250_vm0, %v5197_v41  ;;  %v5441_v27 = vadd.f32 %v3768_v7, %v1858_v57  ;;  %vm3616_vm0 = vcmp.ne.s32.totalorder %v704_v47, 15 }
 0x131   : > { %v1863_v22 = vadd.f32 %v3659_v13, %v5375_v16  ;;  %2415 = vmatprep.mubr.bf16.mxu1 %v5166_v51  ;;  %v3770_v41 = vpop.f32.mrf.mxu1 }
 0x132   : > { %v3661_v43 = vpop.f32.mrf.mxu0  ;;  %v3771_v14 = vadd.f32 %v3770_v41, %v3769_v23 }
 0x133   : > { %v3662_v6 = vadd.f32 %v3661_v43, %v3660_v30  ;;  %v3772_v7 = vpop.f32.mrf.mxu1 }
 0x134   : > { %v3663_v4 = vpop.f32.mrf.mxu0  ;;  %2255 = vmatmul.mubr.bf16.gmra.mxu0 %v6247_v54  ;;  %v1052_v54 = vsel %vm6252_vm3, %v1047_v61, %v6251_v29  ;;  %v5453_v13 = vadd.f32 %v3771_v14, %v1863_v22 }
 0x135   : > { %3432 = vmatprep.mubr.msk.bf16.mxu0 %vm5298_vm6, %v5295_v50  ;;  %v5451_v36 = vpack.c.bf16 %v1052_v54, %v1053_v63  ;;  %v1866_v52 = vadd.f32 %v3662_v6, %v5375_v16  ;;  %vm5457_vm6 = vmpackc.low %vm3616_vm0, %vm6129_vm12  ;;  %v3773_v15 = vpop.f32.mrf.mxu1 }
 0x136   : > { %v3664_v31 = vpop.f32.mrf.mxu0  ;;  %v3774_v1 = vadd.f32 %v3773_v15, %v3772_v7 }
 0x137   : > { %v3665_v3 = vadd.f32 %v3664_v31, %v3663_v4  ;;  %v3775_v47 = vpop.f32.mrf.mxu1  ;;  %v6256_v4 = vld [vmem:[#allocation36_spill] sm:$0xff] }
 0x138   : > { %v3666_v30 = vpop.f32.mrf.mxu0  ;;  %3492 = vmatmul.mubr.msk.bf16.gmra.mxu1 %vm5238_vm11, %v5235_v17  ;;  %v5468_v6 = vadd.f32 %v3774_v1, %v1866_v52 }
 0x139   : > { %v1871_v24 = vadd.f32 %v3665_v3, %v5375_v16  ;;  %2423 = vmatprep.mubr.bf16.mxu1 %v6256_v4  ;;  %v3776_v22 = vpop.f32.mrf.mxu1 }
 0x13a   : > { %v3667_v57 = vpop.f32.mrf.mxu0  ;;  %v3777_v29 = vadd.f32 %v3776_v22, %v3775_v47 }
 0x13b   : > { %v3668_v2 = vadd.f32 %v3667_v57, %v3666_v30  ;;  %v3778_v63 = vpop.f32.mrf.mxu1 }
 0x13c   : > { %v3669_v61 = vpop.f32.mrf.mxu0  ;;  %2263 = vmatmul.mubr.bf16.gmra.mxu0 %v5166_v51  ;;  %v669_v51 = vadd.s32 272, %v4560_v5  ;;  %v5473_v17 = vadd.f32 %v3777_v29, %v1871_v24 }
 0x13d   : > { %3436 = vmatprep.mubr.msk.bf16.mxu0 %vm5457_vm6, %v5451_v36  ;;  %v1874_v41 = vadd.f32 %v3668_v2, %v5375_v16  ;;  %v3779_v30 = vpop.f32.mrf.mxu1 }
 0x13e   : > { %v3670_v23 = vpop.f32.mrf.mxu0  ;;  %v705_v52 = vand.u32 15, %v669_v51  ;;  %v3780_v3 = vadd.f32 %v3779_v30, %v3778_v63 }
 0x13f   : > { %v3671_v31 = vadd.f32 %v3670_v23, %v3669_v61  ;;  %v3781_v15 = vpop.f32.mrf.mxu1  ;;  %v6257_v61 = vld [vmem:[#allocation8_spill] sm:$0xff] }
 0x140   : > { %v3672_v54 = vpop.f32.mrf.mxu0  ;;  %3496 = vmatmul.mubr.msk.bf16.gmra.mxu1 %vm5274_vm9, %v5269_v49  ;;  %v5483_v2 = vadd.f32 %v3780_v3, %v1874_v41  ;;  %vm3583_vm3 = vcmp.ne.s32.totalorder %v705_v52, 0  ;;  %v6259_v41 = vld [vmem:[#allocation14_spill] sm:$0xff]  ;;  %vm6264_vm9 = vnez %v6199_v48 }
 0x141   : > { %v1879_v1 = vadd.f32 %v3671_v31, %v5375_v16  ;;  %2431 = vmatprep.mubr.bf16.mxu1 %v6257_v61  ;;  %v3782_v24 = vpop.f32.mrf.mxu1  ;;  %vm3498_vm11 = vmpackc.low %vm6129_vm12, %vm3583_vm3 }
 0x142   : > { %v3673_v14 = vpop.f32.mrf.mxu0 }
 0x143   : > { %v3674_v7 = vadd.f32 %v3673_v14, %v3672_v54  ;;  %v3784_v51 = vpop.f32.mrf.mxu1  ;;  %v6260_v14 = vpack.c.bf16 %v6258_v9, %v6259_v41 }
 0x144   : > { %v3675_v57 = vpop.f32.mrf.mxu0  ;;  %2271 = vmatmul.mubr.bf16.gmra.mxu0 %v6256_v4  ;;  %v3783_v4 = vadd.f32 %v3782_v24, %v3781_v15 }
 0x145   : > { %4129 = vmatprep.mubr.msk.bf16.mxu0 %vm4737_vm4, %v4748_v26  ;;  %v1882_v49 = vadd.f32 %v3674_v7, %v5375_v16  ;;  %v3785_v26 = vpop.f32.mrf.mxu1  ;;  %vm6261_vm4 = vnez %v6228_v42 }
 0x146   : > { %v3676_v47 = vpop.f32.mrf.mxu0  ;;  %v5487_v29 = vadd.f32 %v3783_v4, %v1879_v1  ;;  %v3786_v54 = vadd.f32 %v3785_v26, %v3784_v51 }
 0x147   : > { %v3677_v23 = vadd.f32 %v3676_v47, %v3675_v57 }
 0x148   : > { %v3678_v22 = vpop.f32.mrf.mxu0  ;;  %v3787_v63 = vpop.f32.mrf.mxu1  ;;  %3500 = vmatmul.mubr.msk.bf16.gmra.mxu1 %vm3498_vm11, %v6260_v14  ;;  %v5500_v30 = vadd.f32 %v3786_v54, %v1882_v49 }
 0x149   : > { %v1887_v7 = vadd.f32 %v3677_v23, %v5375_v16 }
 0x14a   : > { %v3679_v18 = vpop.f32.mrf.mxu0  ;;  %v3788_v3 = vpop.f32.mrf.mxu1 }
 0x14b   : > { %v3680_v59 = vadd.f32 %v3679_v18, %v3678_v22  ;;  %v3789_v15 = vadd.f32 %v3788_v3, %v3787_v63 }
 0x14c   : > { %v3681_v31 = vpop.f32.mrf.mxu0  ;;  %4130 = vmatmul.mubr.msk.bf16.vlgmr.msra.gmra.mxu0 %vm4787_vm7, %v4791_v60  ;;  %v3790_v53 = vpop.f32.mrf.mxu1  ;;  %v4349_v60 = vld [vmem:[#allocation4 + $0x20] sm:$0xff]   ;;  %vm6262_vm7 = vnez %v6184_v8 }
 0x14d   : > { %4133 = vmatprep.mubr.msk.bf16.mxu0 %vm4830_vm15, %v4834_v33  ;;  %v5503_v61 = vadd.f32 %v3789_v15, %v1887_v7  ;;  %v1890_v47 = vadd.f32 %v3680_v59, %v5375_v16  ;;  %4167 = vmatprep.subr.bf16.mxu1 %v4349_v60  ;;  %vm6263_vm15 = vnez %v6192_v55 }
 0x14e   : > { %v3682_v52 = vpop.f32.mrf.mxu0  ;;  %v3791_v4 = vpop.f32.mrf.mxu1  ;;  %4168 = vmatpush3.bf16.msra.mxu1 %v4349_v60 }
 0x14f   : > { %v3683_v57 = vadd.f32 %v3682_v52, %v3681_v31  ;;  %v3792_v32 = vadd.f32 %v3791_v4, %v3790_v53 }
 0x150   : > { %v3684_v1 = vpop.f32.mrf.mxu0  ;;  %v3793_v23 = vpop.f32.mrf.mxu1 }
 0x151   : > { %v5512_v51 = vadd.f32 %v3792_v32, %v1890_v47  ;;  %v1895_v49 = vadd.f32 %v3683_v57, %v5375_v16 }
 0x152   : > { %v3685_v24 = vpop.f32.mrf.mxu0  ;;  %v3794_v26 = vpop.f32.mrf.mxu1 }
 0x153   : > { %v3686_v22 = vadd.f32 %v3685_v24, %v3684_v1  ;;  %v3795_v54 = vadd.f32 %v3794_v26, %v3793_v23  ;;  %v4350_v24 = vld [vmem:[#allocation4 + $0x18] sm:$0xff]  }
 0x154   : > { %v3687_v33 = vpop.f32.mrf.mxu0  ;;  %4134 = vmatmul.mubr.msk.bf16.gmra.mxu0 %vm6206_vm10, %v4872_v19  ;;  %v3796_v63 = vpop.f32.mrf.mxu1  ;;  %4169 = vmatprep.subr.bf16.mxu1 %v4350_v24  ;;  %vm6265_vm10 = vnez %v6205_v28  ;;  %v4352_v28 = vld [vmem:[#allocation4 + $0x8] sm:$0xff]  }
 0x155   : > { %4137 = vmatprep.mubr.msk.bf16.mxu0 %vm6208_vm14, %v4926_v12  ;;  %v5515_v9 = vadd.f32 %v3795_v54, %v1895_v49  ;;  %v1898_v19 = vadd.f32 %v3686_v22, %v5375_v16  ;;  %4170 = vmatpush3.bf16.msra.mxu1 %v4350_v24 }
 0x156   : > { %v3688_v18 = vpop.f32.mrf.mxu0  ;;  %v3797_v41 = vpop.f32.mrf.mxu1 }
 0x157   : > { %v3689_v59 = vadd.f32 %v3688_v18, %v3687_v33  ;;  %v3798_v7 = vadd.f32 %v3797_v41, %v3796_v63 }
 0x158   : > { %v3690_v31 = vpop.f32.mrf.mxu0  ;;  %v3799_v12 = vpop.f32.mrf.mxu1 }
 0x159   : > { %v5524_v52 = vadd.f32 %v3798_v7, %v1898_v19  ;;  %v1903_v3 = vadd.f32 %v3689_v59, %v5375_v16 }
 0x15a   : > { %v3691_v21 = vpop.f32.mrf.mxu0  ;;  %v3800_v15 = vpop.f32.mrf.mxu1 }
 0x15b   : > { %v3692_v14 = vadd.f32 %v3691_v21, %v3690_v31  ;;  %v3801_v53 = vadd.f32 %v3800_v15, %v3799_v12 }
 0x15c   : > { %v3693_v45 = vpop.f32.mrf.mxu0  ;;  %4138 = vmatmul.mubr.msk.bf16.gmra.mxu0 %vm6210_vm8, %v4987_v44  ;;  %v3802_v47 = vpop.f32.mrf.mxu1 }
 0x15d   : > { %4141 = vmatprep.mubr.msk.bf16.mxu0 %vm6212_vm1, %v5042_v62  ;;  %v5527_v4 = vadd.f32 %v3801_v53, %v1903_v3  ;;  %v1906_v44 = vadd.f32 %v3692_v14, %v5375_v16 }
 0x15e   : > { %v3694_v57 = vpop.f32.mrf.mxu0  ;;  %v3803_v22 = vpop.f32.mrf.mxu1 }
 0x15f   : > { %v3695_v1 = vadd.f32 %v3694_v57, %v3693_v45  ;;  %v3804_v58 = vadd.f32 %v3803_v22, %v3802_v47 }
 0x160   : > { %v3696_v60 = vpop.f32.mrf.mxu0  ;;  %v3805_v33 = vpop.f32.mrf.mxu1 }
 0x161   : > { %v5536_v23 = vadd.f32 %v3804_v58, %v1906_v44  ;;  %v1911_v49 = vadd.f32 %v3695_v1, %v5375_v16 }
 0x162   : > { %v3697_v35 = vpop.f32.mrf.mxu0  ;;  %v3806_v26 = vpop.f32.mrf.mxu1 }
 0x163   : > { %v3698_v32 = vadd.f32 %v3697_v35, %v3696_v60  ;;  %v3807_v54 = vadd.f32 %v3806_v26, %v3805_v33  ;;  %v4351_v60 = vld [vmem:[#allocation4 + $0x10] sm:$0xff]  }
 0x164   : > { %v3699_v62 = vpop.f32.mrf.mxu0  ;;  %4142 = vmatmul.mubr.msk.bf16.gmra.mxu0 %vm6216_vm13, %v6214_v0  ;;  %v3808_v63 = vpop.f32.mrf.mxu1  ;;  %4171 = vmatprep.subr.bf16.mxu1 %v4351_v60 }
 0x165   : > { %4145 = vmatprep.mubr.msk.bf16.mxu0 %vm6223_vm2, %v6221_v39  ;;  %v5539_v19 = vadd.f32 %v3807_v54, %v1911_v49  ;;  %v1914_v0 = vadd.f32 %v3698_v32, %v5375_v16  ;;  %4172 = vmatpush3.bf16.msra.mxu1 %v4351_v60  ;;  %v6267_v60 = vld [vmem:[#allocation10_spill] sm:$0xff] }
 0x166   : > { %v3700_v18 = vpop.f32.mrf.mxu0  ;;  %v3809_v21 = vpop.f32.mrf.mxu1  ;;  %4173 = vmatprep.subr.bf16.mxu1 %v4352_v28 }
 0x167   : > { %v3701_v59 = vadd.f32 %v3700_v18, %v3699_v62  ;;  %v3810_v14 = vadd.f32 %v3809_v21, %v3808_v63  ;;  %v670_v62 = vadd.s32 280, %v4560_v5 }
 0x168   : > { %v3702_v31 = vpop.f32.mrf.mxu0  ;;  %v3811_v39 = vpop.f32.mrf.mxu1 }
 0x169   : > { %v5548_v7 = vadd.f32 %v3810_v14, %v1914_v0  ;;  %v1919_v45 = vadd.f32 %v3701_v59, %v5375_v16  ;;  %4174 = vmatpush3.bf16.msra.mxu1 %v4352_v28 }
 0x16a   : > { %v3703_v11 = vpop.f32.mrf.mxu0  ;;  %v3812_v3 = vpop.f32.mrf.mxu1 }
 0x16b   : > { %v3704_v41 = vadd.f32 %v3703_v11, %v3702_v31  ;;  %v3813_v15 = vadd.f32 %v3812_v3, %v3811_v39  ;;  %v706_v31 = vand.u32 15, %v670_v62 }
 0x16c   : > { %v3705_v34 = vpop.f32.mrf.mxu0  ;;  %4146 = vmatmul.mubr.msk.bf16.gmra.mxu0 %vm6261_vm4, %v5151_v20  ;;  %v3814_v53 = vpop.f32.mrf.mxu1 }
 0x16d   : > { %4149 = vmatprep.mubr.msk.bf16.mxu0 %vm6262_vm7, %v5190_v10  ;;  %v5551_v47 = vadd.f32 %v3813_v15, %v1919_v45  ;;  %v1922_v20 = vadd.f32 %v3704_v41, %v5375_v16  ;;  %vm3584_vm14 = vcmp.ne.s32.totalorder %v706_v31, 15 }
 0x16e   : > { %v3706_v12 = vpop.f32.mrf.mxu0  ;;  %v3815_v24 = vpop.f32.mrf.mxu1  ;;  %vm3562_vm8 = vmpackc.low %vm3584_vm14, %vm6129_vm12 }
 0x16f   : > { %v3707_v57 = vadd.f32 %v3706_v12, %v3705_v34  ;;  %v3816_v10 = vadd.f32 %v3815_v24, %v3814_v53  ;;  %v6266_v53 = vld [vmem:[#allocation11_spill] sm:$0xff] }
 0x170   : > { %v3708_v1 = vpop.f32.mrf.mxu0  ;;  %v3817_v35 = vpop.f32.mrf.mxu1 }
 0x171   : > { %v5560_v22 = vadd.f32 %v3816_v10, %v1922_v20  ;;  %v1927_v32 = vadd.f32 %v3707_v57, %v5375_v16  ;;  %v6268_v20 = vpack.c.bf16 %v6266_v53, %v6267_v60 }
 0x172   : > { %v3709_v42 = vpop.f32.mrf.mxu0  ;;  %v3818_v33 = vpop.f32.mrf.mxu1 }
 0x173   : > { %v3710_v44 = vadd.f32 %v3709_v42, %v3708_v1  ;;  %v3819_v18 = vadd.f32 %v3818_v33, %v3817_v35 }
 0x174   : > { %v3711_v8 = vpop.f32.mrf.mxu0  ;;  %4150 = vmatmul.mubr.msk.bf16.gmra.mxu0 %vm6263_vm15, %v5228_v46  ;;  %v3820_v59 = vpop.f32.mrf.mxu1 }
 0x175   : > { %4153 = vmatprep.mubr.msk.bf16.mxu0 %vm6264_vm9, %v5262_v25  ;;  %v5564_v55 = vadd.f32 %v3819_v18, %v1927_v32  ;;  %v1930_v46 = vadd.f32 %v3710_v44, %v5375_v16 }
 0x176   : > { %v3712_v58 = vpop.f32.mrf.mxu0  ;;  %v3821_v48 = vpop.f32.mrf.mxu1 }
 0x177   : > { %v3713_v49 = vadd.f32 %v3712_v58, %v3711_v8  ;;  %v3822_v63 = vadd.f32 %v3821_v48, %v3820_v59 }
 0x178   : > { %v3714_v26 = vpop.f32.mrf.mxu0  ;;  %v3823_v5 = vpop.f32.mrf.mxu1 }
 0x179   : > { %v5573_v11 = vadd.f32 %v3822_v63, %v1930_v46  ;;  %v1935_v21 = vadd.f32 %v3713_v49, %v5375_v16 }
 0x17a   : > { %v3715_v54 = vpop.f32.mrf.mxu0  ;;  %v3824_v14 = vpop.f32.mrf.mxu1 }
 0x17b   : > { %v3716_v25 = vadd.f32 %v3715_v54, %v3714_v26  ;;  %v3825_v39 = vadd.f32 %v3824_v14, %v3823_v5 }
 0x17c   : > { %v3717_v0 = vpop.f32.mrf.mxu0  ;;  %4154 = vmatmul.mubr.msk.bf16.gmra.mxu0 %vm6265_vm10, %v5295_v50  ;;  %v3826_v12 = vpop.f32.mrf.mxu1 }
 0x17d   : > { %4157 = vmatprep.mubr.msk.bf16.mxu0 %vm5457_vm6, %v5451_v36  ;;  %v5577_v50 = vadd.f32 %v3825_v39, %v1935_v21  ;;  %v1938_v3 = vadd.f32 %v3716_v25, %v5375_v16  ;;  %v4353_v39 = vld [vmem:[#allocation4] sm:$0xff]  }
 0x17e   : > { %v3718_v41 = vpop.f32.mrf.mxu0  ;;  %v3827_v36 = vpop.f32.mrf.mxu1  ;;  %4175 = vmatprep.subr.bf16.mxu1 %v4353_v39 }
 0x17f   : > { %v3719_v34 = vadd.f32 %v3718_v41, %v3717_v0  ;;  %v3828_v15 = vadd.f32 %v3827_v36, %v3826_v12  ;;  %4176 = vmatpush3.bf16.msra.mxu1 %v4353_v39  ;;  %v6272_v39 = vld [vmem:[#allocation15_spill] sm:$0xff] }
 0x180   : > { %v3720_v45 = vpop.f32.mrf.mxu0  ;;  %v3829_v42 = vpop.f32.mrf.mxu1 }
 0x181   : > { %v5583_v24 = vadd.f32 %v3828_v15, %v1938_v3  ;;  %v1943_v44 = vadd.f32 %v3719_v34, %v5375_v16 }
 0x182   : > { %v3721_v43 = vpop.f32.mrf.mxu0  ;;  %v3830_v8 = vpop.f32.mrf.mxu1 }
 0x183   : > { %v3722_v57 = vadd.f32 %v3721_v43, %v3720_v45  ;;  %v3831_v32 = vadd.f32 %v3830_v8, %v3829_v42 }
 0x184   : > { %v3723_v1 = vpop.f32.mrf.mxu0  ;;  %4158 = vmatmul.mubr.msk.bf16.gmra.mxu0 %vm3562_vm8, %v6268_v20  ;;  %v3832_v62 = vpop.f32.mrf.mxu1 }
 0x185   : > { %v5586_v33 = vadd.f32 %v3831_v32, %v1943_v44  ;;  %v1946_v49 = vadd.f32 %v3722_v57, %v5375_v16 }
 0x186   : > { %v3724_v10 = vpop.f32.mrf.mxu0  ;;  %v3833_v26 = vpop.f32.mrf.mxu1 }
 0x187   : > { %v3725_v35 = vadd.f32 %v3724_v10, %v3723_v1  ;;  %v3834_v46 = vadd.f32 %v3833_v26, %v3832_v62 }
 0x188   : > { %v3726_v58 = vpop.f32.mrf.mxu0  ;;  %v3835_v31 = vpop.f32.mrf.mxu1 }
 0x189   : > { %v5589_v48 = vadd.f32 %v3834_v46, %v1946_v49  ;;  %v1951_v25 = vadd.f32 %v3725_v35, %v5375_v16 }
 0x18a   : > { %v3727_v18 = vpop.f32.mrf.mxu0  ;;  %v3836_v0 = vpop.f32.mrf.mxu1 }
 0x18b   : > { %v3728_v59 = vadd.f32 %v3727_v18, %v3726_v58  ;;  %v3837_v21 = vadd.f32 %v3836_v0, %v3835_v31 }
 0x18c   : > { %v3857_v54 = vpop.f32.mrf.mxu0  ;;  %v3838_v14 = vpop.f32.mrf.mxu1 }
 0x18d   : > { %v5593_v45 = vadd.f32 %v3837_v21, %v1951_v25  ;;  %v1954_v12 = vadd.f32 %v3728_v59, %v5375_v16 }
 0x18e   : > { %v3858_v63 = vpop.f32.mrf.mxu0  ;;  %v3839_v3 = vpop.f32.mrf.mxu1 }
 0x18f   : > { %v3859_v5 = vadd.f32 %v3858_v63, %v3857_v54  ;;  %v3840_v36 = vadd.f32 %v3839_v3, %v3838_v14  ;;  %v6271_v63 = vld [vmem:[#allocation24_spill] sm:$0xff] }
 0x190   : > { %v3860_v41 = vpop.f32.mrf.mxu0  ;;  %v3969_v15 = vpop.f32.mrf.mxu1 }
 0x191   : > { %v2153_v34 = vadd.f32 %v3859_v5, %v5386_v38  ;;  %v5597_v53 = vadd.f32 %v3840_v36, %v1954_v12 }
 0x192   : > { %v3861_v28 = vpop.f32.mrf.mxu0  ;;  %v3970_v20 = vpop.f32.mrf.mxu1 }
 0x193   : > { %v3862_v43 = vadd.f32 %v3861_v28, %v3860_v41  ;;  %6269 = vst [vmem:[#allocation18_spill] sm:$0xff] %v5597_v53  ;;  %v3971_v42 = vadd.f32 %v3970_v20, %v3969_v15 }
 0x194   : > { %v3863_v57 = vpop.f32.mrf.mxu0  ;;  %v3972_v10 = vpop.f32.mrf.mxu1 }
 0x195   : > { %v2156_v1 = vadd.f32 %v3862_v43, %v5396_v40  ;;  %v5602_v35 = vadd.f32 %v3971_v42, %v2153_v34  ;;  %v6270_v40 = vld [vmem:[#allocation23_spill] sm:$0xff] }
 0x196   : > { %v3864_v60 = vpop.f32.mrf.mxu0  ;;  %v3973_v32 = vpop.f32.mrf.mxu1 }
 0x197   : > { %v3865_v38 = vadd.f32 %v3864_v60, %v3863_v57  ;;  %v3974_v62 = vadd.f32 %v3973_v32, %v3972_v10 }
 0x198   : > { %v3866_v44 = vpop.f32.mrf.mxu0  ;;  %v5604_v18 = vpop.f32.mrf.mxu1 }
 0x199   : > { %v5600_v16 = vadd.f32 %v3865_v38, %v5400_v37  ;;  %v5609_v46 = vadd.f32 %v3974_v62, %v2156_v1 }
 0x19a   : > { %v3867_v8 = vpop.f32.mrf.mxu0  ;;  %v5611_v54 = vpop.f32.mrf.mxu1 }
 0x19b   : > { %v3868_v58 = vadd.f32 %v3867_v8, %v3866_v44 }
 0x19c   : > { %v3869_v49 = vpop.f32.mrf.mxu0  ;;  %v5613_v25 = vpop.f32.mrf.mxu1 }
 0x19d   : > { %v5607_v26 = vadd.f32 %v3868_v58, %v6270_v40 }
 0x19e   : > { %v3870_v59 = vpop.f32.mrf.mxu0  ;;  %v5618_v21 = vpop.f32.mrf.mxu1 }
 0x19f   : > { %v3871_v31 = vadd.f32 %v3870_v59, %v3869_v49 }
 0x1a0   : > { %v3872_v37 = vpop.f32.mrf.mxu0  ;;  %v5620_v34 = vpop.f32.mrf.mxu1 }
 0x1a1   : > { %v5616_v0 = vadd.f32 %v3871_v31, %v6271_v63 }
 0x1a2   : > { %v3873_v5 = vpop.f32.mrf.mxu0  ;;  %v5625_v3 = vpop.f32.mrf.mxu1 }
 0x1a3   : > { %v3874_v41 = vadd.f32 %v3873_v5, %v3872_v37 }
 0x1a4   : > { %v3875_v14 = vpop.f32.mrf.mxu0  ;;  %v5627_v57 = vpop.f32.mrf.mxu1 }
 0x1a5   : > { %v5623_v12 = vadd.f32 %v3874_v41, %v6272_v39 }
 0x1a6   : > { %v3876_v28 = vpop.f32.mrf.mxu0  ;;  %v5632_v60 = vpop.f32.mrf.mxu1 }
 0x1a7   : > { %v3877_v43 = vadd.f32 %v3876_v28, %v3875_v14 }
 0x1a8   : > { %v3878_v36 = vpop.f32.mrf.mxu0  ;;  %v5634_v42 = vpop.f32.mrf.mxu1 }
 0x1a9   : > { %v5630_v15 = vadd.f32 %v3877_v43, %v5429_v56 }
 0x1aa   : > { %v3879_v1 = vpop.f32.mrf.mxu0  ;;  %v5639_v8 = vpop.f32.mrf.mxu1 }
 0x1ab   : > { %v3880_v20 = vadd.f32 %v3879_v1, %v3878_v36 }
 0x1ac   : > { %v3881_v38 = vpop.f32.mrf.mxu0  ;;  %v5641_v62 = vpop.f32.mrf.mxu1 }
 0x1ad   : > { %v5637_v44 = vadd.f32 %v3880_v20, %v5441_v27 }
 0x1ae   : > { %v3882_v10 = vpop.f32.mrf.mxu0  ;;  %v5646_v40 = vpop.f32.mrf.mxu1 }
 0x1af   : > { %v3883_v32 = vadd.f32 %v3882_v10, %v3881_v38 }
 0x1b0   : > { %v3884_v58 = vpop.f32.mrf.mxu0  ;;  %v5648_v37 = vpop.f32.mrf.mxu1 }
 0x1b1   : > { %v5644_v56 = vadd.f32 %v3883_v32, %v5453_v13 }
 0x1b2   : > { %v3885_v49 = vpop.f32.mrf.mxu0  ;;  %v5653_v5 = vpop.f32.mrf.mxu1 }
 0x1b3   : > { %v3886_v59 = vadd.f32 %v3885_v49, %v3884_v58 }
 0x1b4   : > { %v3887_v31 = vpop.f32.mrf.mxu0  ;;  %v5655_v39 = vpop.f32.mrf.mxu1 }
 0x1b5   : > { %v5651_v27 = vadd.f32 %v3886_v59, %v5468_v6 }
 0x1b6   : > { %v3888_v63 = vpop.f32.mrf.mxu0  ;;  %v5660_v43 = vpop.f32.mrf.mxu1 }
 0x1b7   : > { %6273 = vst [vmem:[#allocation19_spill] sm:$0xff] %v5651_v27  ;;  %v3889_v41 = vadd.f32 %v3888_v63, %v3887_v31 }
 0x1b8   : > { %v3890_v14 = vpop.f32.mrf.mxu0  ;;  %v5662_v20 = vpop.f32.mrf.mxu1 }
 0x1b9   : > { %v5658_v13 = vadd.f32 %v3889_v41, %v5473_v17 }
 0x1ba   : > { %v3891_v28 = vpop.f32.mrf.mxu0  ;;  %v5667_v10 = vpop.f32.mrf.mxu1 }
 0x1bb   : > { %v3892_v36 = vadd.f32 %v3891_v28, %v3890_v14 }
 0x1bc   : > { %v3893_v1 = vpop.f32.mrf.mxu0  ;;  %v5669_v49 = vpop.f32.mrf.mxu1 }
 0x1bd   : > { %v5665_v6 = vadd.f32 %v3892_v36, %v5483_v2 }
 0x1be   : > { %v3894_v38 = vpop.f32.mrf.mxu0  ;;  %v5674_v31 = vpop.f32.mrf.mxu1 }
 0x1bf   : > { %v3895_v32 = vadd.f32 %v3894_v38, %v3893_v1 }
 0x1c0   : > { %v3896_v58 = vpop.f32.mrf.mxu0  ;;  %v5676_v14 = vpop.f32.mrf.mxu1 }
 0x1c1   : > { %v5672_v17 = vadd.f32 %v3895_v32, %v5487_v29 }
 0x1c2   : > { %v3897_v59 = vpop.f32.mrf.mxu0  ;;  %v5681_v36 = vpop.f32.mrf.mxu1 }
 0x1c3   : > { %6274 = vst [vmem:[#allocation28_spill] sm:$0xff] %v5672_v17  ;;  %v3898_v63 = vadd.f32 %v3897_v59, %v3896_v58  ;;  %6276 = vst [vmem:[#allocation16_spill] sm:$0xff] %v5681_v36 }
 0x1c4   : > { %v3899_v41 = vpop.f32.mrf.mxu0  ;;  %v5683_v53 = vpop.f32.mrf.mxu1 }
 0x1c5   : > { %v5679_v2 = vadd.f32 %v3898_v63, %v5500_v30  ;;  %6277 = vst [vmem:[#allocation22_spill] sm:$0xff] %v5683_v53 }
 0x1c6   : > { %v3900_v28 = vpop.f32.mrf.mxu0  ;;  %v5688_v17 = vpop.f32.mrf.mxu1 }
 0x1c7   : > { %6275 = vst [vmem:[#allocation29_spill] sm:$0xff] %v5679_v2  ;;  %v3901_v1 = vadd.f32 %v3900_v28, %v3899_v41  ;;  %6279 = vst [vmem:[#allocation33_spill] sm:$0xff] %v5688_v17 }
 0x1c8   : > { %v3902_v38 = vpop.f32.mrf.mxu0  ;;  %v5690_v27 = vpop.f32.mrf.mxu1 }
 0x1c9   : > { %v5686_v29 = vadd.f32 %v3901_v1, %v5503_v61 }
 0x1ca   : > { %v3903_v32 = vpop.f32.mrf.mxu0  ;;  %v5695_v2 = vpop.f32.mrf.mxu1 }
 0x1cb   : > { %6278 = vst [vmem:[#allocation20_spill] sm:$0xff] %v5686_v29  ;;  %v3904_v58 = vadd.f32 %v3903_v32, %v3902_v38 }
 0x1cc   : > { %v3905_v59 = vpop.f32.mrf.mxu0  ;;  %v5697_v36 = vpop.f32.mrf.mxu1 }
 0x1cd   : > { %v5693_v30 = vadd.f32 %v3904_v58, %v5512_v51 }
 0x1ce   : > { %v3906_v63 = vpop.f32.mrf.mxu0  ;;  %v5702_v29 = vpop.f32.mrf.mxu1 }
 0x1cf   : > { %6280 = vst [vmem:[#allocation17_spill] sm:$0xff] %v5693_v30  ;;  %v3907_v41 = vadd.f32 %v3906_v63, %v3905_v59  ;;  %6282 = vst [vmem:[#allocation26_spill] sm:$0xff] %v5702_v29 }
 0x1d0   : > { %v3908_v28 = vpop.f32.mrf.mxu0  ;;  %v5704_v17 = vpop.f32.mrf.mxu1 }
 0x1d1   : > { %v5700_v61 = vadd.f32 %v3907_v41, %v5515_v9 }
 0x1d2   : > { %v3909_v1 = vpop.f32.mrf.mxu0  ;;  %v5709_v30 = vpop.f32.mrf.mxu1 }
 0x1d3   : > { %6281 = vst [vmem:[#allocation25_spill] sm:$0xff] %v5700_v61  ;;  %v3910_v38 = vadd.f32 %v3909_v1, %v3908_v28  ;;  %6284 = vst [vmem:[#allocation30_spill] sm:$0xff] %v5709_v30 }
 0x1d4   : > { %v3911_v32 = vpop.f32.mrf.mxu0  ;;  %v5711_v53 = vpop.f32.mrf.mxu1 }
 0x1d5   : > { %v5707_v51 = vadd.f32 %v3910_v38, %v5524_v52  ;;  %6285 = vst [vmem:[#allocation31_spill] sm:$0xff] %v5711_v53 }
 0x1d6   : > { %v3912_v58 = vpop.f32.mrf.mxu0  ;;  %v5716_v61 = vpop.f32.mrf.mxu1 }
 0x1d7   : > { %6283 = vst [vmem:[#allocation21_spill] sm:$0xff] %v5707_v51  ;;  %v3913_v59 = vadd.f32 %v3912_v58, %v3911_v32  ;;  %6287 = vst [vmem:[#allocation34_spill] sm:$0xff] %v5716_v61 }
 0x1d8   : > { %v3914_v63 = vpop.f32.mrf.mxu0  ;;  %v5718_v29 = vpop.f32.mrf.mxu1 }
 0x1d9   : > { %v5714_v9 = vadd.f32 %v3913_v59, %v5527_v4 }
 0x1da   : > { %v3915_v41 = vpop.f32.mrf.mxu0  ;;  %v5723_v51 = vpop.f32.mrf.mxu1 }
 0x1db   : > { %6286 = vst [vmem:[#allocation27_spill] sm:$0xff] %v5714_v9  ;;  %v3916_v28 = vadd.f32 %v3915_v41, %v3914_v63 }
 0x1dc   : > { %v3917_v1 = vpop.f32.mrf.mxu0  ;;  %v5725_v30 = vpop.f32.mrf.mxu1 }
 0x1dd   : > { %v5721_v52 = vadd.f32 %v3916_v28, %v5536_v23 }
 0x1de   : > { %v3918_v38 = vpop.f32.mrf.mxu0  ;;  %v5730_v9 = vpop.f32.mrf.mxu1 }
 0x1df   : > { %6288 = vst [vmem:[#allocation35_spill] sm:$0xff] %v5721_v52  ;;  %v3919_v32 = vadd.f32 %v3918_v38, %v3917_v1  ;;  %6290 = vst [vmem:[#allocation13_spill] sm:$0xff] %v5730_v9 }
 0x1e0   : > { %v3920_v58 = vpop.f32.mrf.mxu0  ;;  %v5732_v61 = vpop.f32.mrf.mxu1 }
 0x1e1   : > { %v5728_v4 = vadd.f32 %v3919_v32, %v5539_v19  ;;  %6291 = vst [vmem:[#allocation9_spill] sm:$0xff] %v5732_v61 }
 0x1e2   : > { %v3921_v59 = vpop.f32.mrf.mxu0  ;;  %v5737_v53 = vpop.f32.mrf.mxu1 }
 0x1e3   : > { %6289 = vst [vmem:[#allocation32_spill] sm:$0xff] %v5728_v4  ;;  %v3922_v63 = vadd.f32 %v3921_v59, %v3920_v58 }
 0x1e4   : > { %v3923_v41 = vpop.f32.mrf.mxu0  ;;  %v5742_v4 = vpop.f32.mrf.mxu1 }
 0x1e5   : > { %v5735_v23 = vadd.f32 %v3922_v63, %v5548_v7 }
 0x1e6   : > { %v3924_v28 = vpop.f32.mrf.mxu0  ;;  %v5747_v7 = vpop.f32.mrf.mxu1 }
 0x1e7   : > { %6292 = vst [vmem:[#allocation36_spill] sm:$0xff] %v5735_v23  ;;  %v3925_v52 = vadd.f32 %v3924_v28, %v3923_v41 }
 0x1e8   : > { %v3926_v1 = vpop.f32.mrf.mxu0 }
 0x1e9   : > { %v5740_v38 = vadd.f32 %v3925_v52, %v5551_v47  ;;  %v5752_v47 = vpop.f32.mrf.mxu1 }
 0x1ea   : > { %v3927_v19 = vpop.f32.mrf.mxu0 }
 0x1eb   : > { %6293 = vst [vmem:[#allocation8_spill] sm:$0xff] %v5740_v38  ;;  %v3928_v32 = vadd.f32 %v3927_v19, %v3926_v1 }
 0x1ec   : > { %v3929_v9 = vpop.f32.mrf.mxu0 }
 0x1ed   : > { %v5745_v58 = vadd.f32 %v3928_v32, %v5560_v22  ;;  %v5757_v22 = vpop.f32.mrf.mxu1 }
 0x1ee   : > { %v3930_v59 = vpop.f32.mrf.mxu0 }
 0x1ef   : > { %6294 = vst [vmem:[#allocation12_spill] sm:$0xff] %v5745_v58  ;;  %v3931_v61 = vadd.f32 %v3930_v59, %v3929_v9 }
 0x1f0   : > { %v3932_v63 = vpop.f32.mrf.mxu0 }
 0x1f1   : > { %v5750_v41 = vadd.f32 %v3931_v61, %v5564_v55  ;;  %v5762_v55 = vpop.f32.mrf.mxu1 }
 0x1f2   : > { %v3933_v28 = vpop.f32.mrf.mxu0 }
 0x1f3   : > { %6295 = vst [vmem:[#allocation14_spill] sm:$0xff] %v5750_v41  ;;  %v3934_v23 = vadd.f32 %v3933_v28, %v3932_v63 }
 0x1f4   : > { %v3935_v52 = vpop.f32.mrf.mxu0 }
 0x1f5   : > { %v5755_v1 = vadd.f32 %v3934_v23, %v5573_v11  ;;  %v5767_v11 = vpop.f32.mrf.mxu1 }
 0x1f6   : > { %v3936_v19 = vpop.f32.mrf.mxu0 }
 0x1f7   : > { %6296 = vst [vmem:[#allocation11_spill] sm:$0xff] %v5755_v1  ;;  %v3937_v38 = vadd.f32 %v3936_v19, %v3935_v52 }
 0x1f8   : > { %v3938_v32 = vpop.f32.mrf.mxu0 }
 0x1f9   : > { %v5760_v9 = vadd.f32 %v3937_v38, %v5577_v50  ;;  %v5772_v50 = vpop.f32.mrf.mxu1 }
 0x1fa   : > { %v3939_v59 = vpop.f32.mrf.mxu0 }
 0x1fb   : > { %6297 = vst [vmem:[#allocation10_spill] sm:$0xff] %v5760_v9  ;;  %v3940_v58 = vadd.f32 %v3939_v59, %v3938_v32 }
 0x1fc   : > { %v3941_v61 = vpop.f32.mrf.mxu0 }
 0x1fd   : > { %v5765_v63 = vadd.f32 %v3940_v58, %v5583_v24  ;;  %v5777_v24 = vpop.f32.mrf.mxu1 }
 0x1fe   : > { %v3942_v28 = vpop.f32.mrf.mxu0 }
 0x1ff   : > { %v3943_v41 = vadd.f32 %v3942_v28, %v3941_v61  ;;  %v3977_v61 = vadd.f32 %v5611_v54, %v5604_v18  ;;  %v3980_v28 = vadd.f32 %v5618_v21, %v5613_v25  ;;  %v3983_v25 = vadd.f32 %v5625_v3, %v5620_v34 }
 0x200   : > { %v3944_v23 = vpop.f32.mrf.mxu0 }
 0x201   : > { %v5770_v52 = vadd.f32 %v3943_v41, %v5586_v33 }
 0x202   : > { %v3945_v19 = vpop.f32.mrf.mxu0 }
 0x203   : > { %v3946_v1 = vadd.f32 %v3945_v19, %v3944_v23  ;;  %v5790_v23 = vpop.f32.mrf.mxu1 }
 0x204   : > { %v3947_v38 = vpop.f32.mrf.mxu0 }
 0x205   : > { %v5775_v32 = vadd.f32 %v3946_v1, %v5589_v48  ;;  %v2322_v1 = vadd.f32 %v3977_v61, %v5600_v16  ;;  %v3992_v16 = vadd.f32 %v5646_v40, %v5641_v62  ;;  %v2330_v62 = vadd.f32 %v3983_v25, %v5616_v0 }
 0x206   : > { %v3948_v59 = vpop.f32.mrf.mxu0  ;;  %v4004_v0 = vadd.f32 %v5674_v31, %v5669_v49 }
 0x207   : > { %6298 = vst [vmem:[#allocation23_spill] sm:$0xff] %v5775_v32  ;;  %v3949_v9 = vadd.f32 %v3948_v59, %v3947_v38  ;;  %v2325_v59 = vadd.f32 %v3980_v28, %v5607_v26  ;;  %v5794_v32 = vpop.f32.mrf.mxu1  ;;  %v3986_v28 = vadd.f32 %v5632_v60, %v5627_v57  ;;  %v2341_v40 = vadd.f32 %v3992_v16, %v5637_v44 }
 0x208   : > { %v5779_v58 = vpop.f32.mrf.mxu0  ;;  %v4001_v57 = vadd.f32 %v5667_v10, %v5662_v20  ;;  %v3998_v16 = vadd.f32 %v5660_v43, %v5655_v39  ;;  %v2357_v49 = vadd.f32 %v4004_v0, %v5665_v6  ;;  %v4013_v39 = vadd.f32 %v5695_v2, %v5690_v27 }
 0x209   : > { %v5784_v33 = vadd.f32 %v3949_v9, %v5593_v45  ;;  %v3989_v45 = vadd.f32 %v5639_v8, %v5634_v42 }
 0x20a   : > { %v5786_v41 = vpop.f32.mrf.mxu0 }
 0x20c   : > { %v4131_v48 = vpop.f32.mrf.mxu0 }
 0x20d   : > { %v2483_v38 = vadd.f32 %v4131_v48, %v2322_v1  ;;  %v5806_v1 = vpop.f32.mrf.mxu1 }
 0x20e   : > { %v2474_v19 = vpop.f32.mrf.mxu0 }
 0x20f   : > { %v2475_v54 = vadd.f32 %v2474_v19, %v5602_v35  ;;  %v2603_v61 = vmax.f32 %v2483_v38, 0.0  ;;  %v5811_v38 = vpop.f32.mrf.mxu1 }
 0x210   : > { %v4132_v18 = vpop.f32.mrf.mxu0 }
 0x211   : > { %v2486_v9 = vadd.f32 %v4132_v18, %v2325_v59  ;;  %v2601_v8 = vmax.f32 %v2475_v54, 0.0  ;;  %v2338_v59 = vadd.f32 %v3989_v45, %v5630_v15  ;;  %v2333_v54 = vadd.f32 %v3986_v28, %v5623_v12  ;;  %v5822_v20 = vpop.f32.mrf.mxu1 }
 0x212   : > { %v2477_v21 = vpop.f32.mrf.mxu0  ;;  %v3995_v15 = vadd.f32 %v5653_v5, %v5648_v37 }
 0x213   : > { %v2604_v48 = vmax.f32 %v2486_v9, 0.0  ;;  %v2478_v26 = vadd.f32 %v2477_v21, %v5609_v46  ;;  %v5827_v31 = vpop.f32.mrf.mxu1 }
 0x214   : > { %v4135_v42 = vpop.f32.mrf.mxu0 }
 0x215   : > { %v2634_v35 = vpack.c.bf16 %v2604_v48, %v2603_v61  ;;  %v2602_v19 = vmax.f32 %v2478_v26, 0.0  ;;  %v2499_v18 = vadd.f32 %v4135_v42, %v2338_v59  ;;  %v2354_v26 = vadd.f32 %v4001_v57, %v5658_v13  ;;  %v6300_v13 = vld [vmem:[#allocation16_spill] sm:$0xff]  ;;  %v6303_v57 = vld [vmem:[#allocation33_spill] sm:$0xff]  ;;  %v5838_v27 = vpop.f32.mrf.mxu1 }
 0x216   : > { %v2490_v34 = vpop.f32.mrf.mxu0  ;;  %v2346_v42 = vadd.f32 %v3995_v15, %v5644_v56  ;;  %v6301_v56 = vld [vmem:[#allocation26_spill] sm:$0xff] }
 0x217   : > { %v2633_v3 = vpack.c.bf16 %v2602_v19, %v2601_v8  ;;  %v2491_v60 = vadd.f32 %v2490_v34, %v2330_v62  ;;  %v2607_v44 = vmax.f32 %v2499_v18, 0.0  ;;  %v6299_v19 = vld [vmem:[#allocation19_spill] sm:$0xff]  ;;  %v4007_v34 = vadd.f32 %v6300_v13, %v5676_v14 }
 0x218   : > { %v4136_v46 = vpop.f32.mrf.mxu0  ;;  %v2349_v59 = vadd.f32 %v3998_v16, %v6299_v19  ;;  %v4016_v18 = vadd.f32 %v6301_v56, %v5697_v36  ;;  %v6306_v36 = vld [vmem:[#allocation17_spill] sm:$0xff]  ;;  %v6310_v13 = vld [vmem:[#allocation31_spill] sm:$0xff] }
 0x219   : > { %v2502_v9 = vadd.f32 %v4136_v46, %v2341_v40  ;;  %4177 = vmatprep.mubr.bf16.mxu1 %v2633_v3  ;;  %v2605_v61 = vmax.f32 %v2491_v60, 0.0  ;;  %v6302_v46 = vld [vmem:[#allocation22_spill] sm:$0xff] }
 0x21a   : > { %v2493_v45 = vpop.f32.mrf.mxu0  ;;  %4178 = vmatmul.mubr.bf16.vlgmr.msra.gmra.mxu1 %v2634_v35  ;;  %v4010_v60 = vadd.f32 %v6303_v57, %v6302_v46 }
 0x21b   : > { %v2608_v25 = vmax.f32 %v2502_v9, 0.0  ;;  %v2494_v21 = vadd.f32 %v2493_v45, %v2333_v54  ;;  %v6304_v45 = vld [vmem:[#allocation20_spill] sm:$0xff] }
 0x21c   : > { %v4139_v10 = vpop.f32.mrf.mxu0  ;;  %v2370_v0 = vadd.f32 %v4013_v39, %v6304_v45  ;;  %v6309_v39 = vld [vmem:[#allocation13_spill] sm:$0xff]  ;;  %v4037_v45 = vadd.f32 %v5757_v22, %v5752_v47 }
 0x21d   : > { %v2636_v48 = vpack.c.bf16 %v2608_v25, %v2607_v44  ;;  %v2606_v12 = vmax.f32 %v2494_v21, 0.0  ;;  %v2515_v28 = vadd.f32 %v4139_v10, %v2354_v26  ;;  %v6305_v21 = vld [vmem:[#allocation28_spill] sm:$0xff]  ;;  %v2373_v10 = vadd.f32 %v4016_v18, %v6306_v36 }
 0x21e   : > { %v2506_v37 = vpop.f32.mrf.mxu0  ;;  %v2362_v16 = vadd.f32 %v4007_v34, %v6305_v21  ;;  %v6311_v34 = vld [vmem:[#allocation34_spill] sm:$0xff]  ;;  %v6316_v21 = vld [vmem:[#allocation9_spill] sm:$0xff] }
 0x21f   : > { %v2635_v5 = vpack.c.bf16 %v2606_v12, %v2605_v61  ;;  %v2507_v43 = vadd.f32 %v2506_v37, %v2346_v42  ;;  %v2611_v6 = vmax.f32 %v2515_v28, 0.0  ;;  %v5843_v61 = vpop.f32.mrf.mxu1  ;;  %v4025_v12 = vadd.f32 %v5723_v51, %v5718_v29  ;;  %v6308_v42 = vld [vmem:[#allocation30_spill] sm:$0xff] }
 0x220   : > { %v4140_v8 = vpop.f32.mrf.mxu0 }
 0x221   : > { %v2518_v35 = vadd.f32 %v4140_v8, %v2357_v49  ;;  %4181 = vmatprep.mubr.bf16.mxu1 %v2635_v5  ;;  %v2609_v9 = vmax.f32 %v2507_v43, 0.0  ;;  %v6307_v5 = vld [vmem:[#allocation29_spill] sm:$0xff]  ;;  %v4019_v49 = vadd.f32 %v6308_v42, %v5704_v17  ;;  %v4028_v43 = vadd.f32 %v6309_v39, %v5725_v30  ;;  %v5854_v29 = vpop.f32.mrf.mxu1  ;;  %v6314_v30 = vld [vmem:[#allocation35_spill] sm:$0xff] }
 0x222   : > { %v2509_v3 = vpop.f32.mrf.mxu0  ;;  %4182 = vmatmul.mubr.bf16.gmra.mxu1 %v2636_v48  ;;  %v2365_v28 = vadd.f32 %v4010_v60, %v6307_v5  ;;  %v6313_v60 = vld [vmem:[#allocation25_spill] sm:$0xff] }
 0x223   : > { %v2612_v62 = vmax.f32 %v2518_v35, 0.0  ;;  %v2510_v40 = vadd.f32 %v2509_v3, %v2349_v59  ;;  %v4022_v3 = vadd.f32 %v6311_v34, %v6310_v13  ;;  %v4049_v34 = vadd.f32 %v5811_v38, %v5806_v1 }
 0x224   : > { %v4143_v2 = vpop.f32.mrf.mxu0 }
 0x225   : > { %v2638_v54 = vpack.c.bf16 %v2612_v62, %v2611_v6  ;;  %v2610_v15 = vmax.f32 %v2510_v40, 0.0  ;;  %v2531_v25 = vadd.f32 %v4143_v2, %v2370_v0  ;;  %v6312_v62 = vld [vmem:[#allocation27_spill] sm:$0xff]  ;;  %v2378_v2 = vadd.f32 %v4019_v49, %v6313_v60  ;;  %v6317_v49 = vld [vmem:[#allocation8_spill] sm:$0xff] }
 0x226   : > { %v2522_v14 = vpop.f32.mrf.mxu0  ;;  %v2386_v40 = vadd.f32 %v4025_v12, %v6312_v62 }
 0x227   : > { %v2637_v44 = vpack.c.bf16 %v2610_v15, %v2609_v9  ;;  %v2523_v26 = vadd.f32 %v2522_v14, %v2362_v16  ;;  %v2615_v35 = vmax.f32 %v2531_v25, 0.0  ;;  %v2389_v9 = vadd.f32 %v4028_v43, %v6314_v30  ;;  %v6321_v30 = vld [vmem:[#allocation10_spill] sm:$0xff] }
 0x228   : > { %v4144_v48 = vpop.f32.mrf.mxu0  ;;  %v4031_v16 = vadd.f32 %v5737_v53, %v6316_v21  ;;  %v6323_v21 = vld [vmem:[#allocation11_spill] sm:$0xff] }
 0x229   : > { %v2534_v37 = vadd.f32 %v4144_v48, %v2373_v10  ;;  %4185 = vmatprep.mubr.bf16.mxu1 %v2637_v44  ;;  %v2613_v56 = vmax.f32 %v2523_v26, 0.0  ;;  %v6315_v44 = vld [vmem:[#allocation21_spill] sm:$0xff]  ;;  %v4040_v10 = vadd.f32 %v5767_v11, %v5762_v55 }
 0x22a   : > { %v2525_v8 = vpop.f32.mrf.mxu0  ;;  %4186 = vmatmul.mubr.bf16.gmra.mxu1 %v2638_v54  ;;  %v5859_v54 = vpop.f32.mrf.mxu1  ;;  %v2381_v25 = vadd.f32 %v4022_v3, %v6315_v44  ;;  %v6320_v3 = vld [vmem:[#allocation36_spill] sm:$0xff] }
 0x22b   : > { %v2616_v19 = vmax.f32 %v2534_v37, 0.0  ;;  %v2526_v59 = vadd.f32 %v2525_v8, %v2365_v28  ;;  %v4034_v37 = vadd.f32 %v5747_v7, %v5742_v4  ;;  %v2402_v8 = vadd.f32 %v4037_v45, %v6317_v49 }
 0x22c   : > { %v4147_v51 = vpop.f32.mrf.mxu0  ;;  %v4059_v47 = vpop.f32.mrf.mxu1 }
 0x22d   : > { %v2640_v18 = vpack.c.bf16 %v2616_v19, %v2615_v35  ;;  %v2614_v6 = vmax.f32 %v2526_v59, 0.0  ;;  %v2547_v57 = vadd.f32 %v4147_v51, %v2386_v40  ;;  %v6318_v35 = vld [vmem:[#allocation32_spill] sm:$0xff]  ;;  %v2397_v51 = vadd.f32 %v4034_v37, %v6320_v3 }
 0x22e   : > { %v2538_v17 = vpop.f32.mrf.mxu0  ;;  %v2394_v19 = vadd.f32 %v4031_v16, %v6318_v35  ;;  %v6319_v59 = vld [vmem:[#allocation12_spill] sm:$0xff]  ;;  %v4060_v11 = vpop.f32.mrf.mxu1 }
 0x22f   : > { %v2639_v46 = vpack.c.bf16 %v2614_v6, %v2613_v56  ;;  %v2539_v0 = vadd.f32 %v2538_v17, %v2378_v2  ;;  %v2619_v48 = vmax.f32 %v2547_v57, 0.0  ;;  %v2405_v55 = vadd.f32 %v4040_v10, %v6319_v59  ;;  %v6324_v10 = vld [vmem:[#allocation18_spill] sm:$0xff] }
 0x230   : > { %v4148_v15 = vpop.f32.mrf.mxu0  ;;  %v4043_v56 = vadd.f32 %v5777_v24, %v5772_v50  ;;  %v4052_v6 = vadd.f32 %v5827_v31, %v5822_v20  ;;  %v4062_v1 = vpop.f32.mrf.mxu1  ;;  %v3952_v50 = vadd.f32 %v5786_v41, %v5779_v58  ;;  %v6322_v20 = vld [vmem:[#allocation14_spill] sm:$0xff] }
 0x231   : > { %v2550_v14 = vadd.f32 %v4148_v15, %v2389_v9  ;;  %4189 = vmatprep.mubr.bf16.mxu1 %v2639_v46  ;;  %v2617_v5 = vmax.f32 %v2539_v0, 0.0  ;;  %v4046_v46 = vadd.f32 %v5794_v32, %v5790_v23  ;;  %v2418_v9 = vadd.f32 %v4049_v34, %v6321_v30 }
 0x232   : > { %v2541_v36 = vpop.f32.mrf.mxu0  ;;  %4190 = vmatmul.mubr.bf16.gmra.mxu1 %v2640_v18  ;;  %v2410_v31 = vadd.f32 %v4043_v56, %v6322_v20  ;;  %v2421_v0 = vadd.f32 %v4052_v6, %v5765_v63  ;;  %v4061_v32 = vadd.f32 %v4060_v11, %v4059_v47  ;;  %v2276_v58 = vadd.f32 %v3952_v50, %v6324_v10 }
 0x233   : > { %v2620_v12 = vmax.f32 %v2550_v14, 0.0  ;;  %v2542_v26 = vadd.f32 %v2541_v36, %v2381_v25  ;;  %v4063_v14 = vpop.f32.mrf.mxu1  ;;  %v2413_v16 = vadd.f32 %v4046_v46, %v6323_v21  ;;  %v4055_v36 = vadd.f32 %v5843_v61, %v5838_v27 }
 0x234   : > { %v4151_v22 = vpop.f32.mrf.mxu0  ;;  %v4058_v63 = vadd.f32 %v5859_v54, %v5854_v29 }
 0x235   : > { %v2642_v28 = vpack.c.bf16 %v2620_v12, %v2619_v48  ;;  %v2618_v42 = vmax.f32 %v2542_v26, 0.0  ;;  %v2563_v43 = vadd.f32 %v4151_v22, %v2402_v8  ;;  %v4064_v48 = vadd.f32 %v4063_v14, %v4062_v1 }
 0x236   : > { %v2554_v39 = vpop.f32.mrf.mxu0  ;;  %v2426_v61 = vadd.f32 %v4055_v36, %v5770_v52  ;;  %v5900_v52 = vld [vmem:[%s5986_s6] ss:$0 sm:$0xff] }
 0x237   : > { %v2641_v53 = vpack.c.bf16 %v2618_v42, %v2617_v5  ;;  %v2555_v4 = vadd.f32 %v2554_v39, %v2394_v19  ;;  %v2623_v62 = vmax.f32 %v2563_v43, 0.0  ;;  %v2434_v42 = vadd.f32 %v4061_v32, %v5784_v33  ;;  %v6325_v19 = vld [vmem:[#allocation23_spill] sm:$0xff] }
 0x238   : > { %v4152_v13 = vpop.f32.mrf.mxu0  ;;  %v2437_v39 = vadd.f32 %v4064_v48, %v2276_v58  ;;  %v2429_v59 = vadd.f32 %v4058_v63, %v6325_v19 }
 0x239   : > { %v2566_v7 = vadd.f32 %v4152_v13, %v2405_v55  ;;  %4193 = vmatprep.mubr.bf16.mxu1 %v2641_v53  ;;  %v2621_v57 = vmax.f32 %v2555_v4, 0.0 }
 0x23a   : > { %v2557_v18 = vpop.f32.mrf.mxu0  ;;  %4194 = vmatmul.mubr.bf16.gmra.mxu1 %v2642_v28 }
 0x23b   : > { %v2624_v40 = vmax.f32 %v2566_v7, 0.0  ;;  %v2558_v17 = vadd.f32 %v2557_v18, %v2397_v51 }
 0x23c   : > { %v4155_v38 = vpop.f32.mrf.mxu0 }
 0x23d   : > { %v2644_v60 = vpack.c.bf16 %v2624_v40, %v2623_v62  ;;  %v2622_v2 = vmax.f32 %v2558_v17, 0.0  ;;  %v2579_v45 = vadd.f32 %v4155_v38, %v2418_v9 }
 0x23e   : > { %v2570_v24 = vpop.f32.mrf.mxu0 }
 0x23f   : > { %v2643_v15 = vpack.c.bf16 %v2622_v2, %v2621_v57  ;;  %v2571_v23 = vadd.f32 %v2570_v24, %v2410_v31  ;;  %v2627_v12 = vmax.f32 %v2579_v45, 0.0 }
 0x240   : > { %v4156_v44 = vpop.f32.mrf.mxu0 }
 0x241   : > { %v2582_v25 = vadd.f32 %v4156_v44, %v2421_v0  ;;  %4197 = vmatprep.mubr.bf16.mxu1 %v2643_v15  ;;  %v2625_v22 = vmax.f32 %v2571_v23, 0.0 }
 0x242   : > { %v2573_v41 = vpop.f32.mrf.mxu0  ;;  %4198 = vmatmul.mubr.bf16.gmra.mxu1 %v2644_v60 }
 0x243   : > { %v2628_v26 = vmax.f32 %v2582_v25, 0.0  ;;  %v2574_v37 = vadd.f32 %v2573_v41, %v2413_v16 }
 0x244   : > { %v4159_v47 = vpop.f32.mrf.mxu0 }
 0x245   : > { %v2646_v5 = vpack.c.bf16 %v2628_v26, %v2627_v12  ;;  %v2626_v28 = vmax.f32 %v2574_v37, 0.0  ;;  %v2595_v27 = vadd.f32 %v4159_v47, %v2434_v42 }
 0x246   : > { %v2586_v49 = vpop.f32.mrf.mxu0 }
 0x247   : > { %v2645_v8 = vpack.c.bf16 %v2626_v28, %v2625_v22  ;;  %v2587_v43 = vadd.f32 %v2586_v49, %v2426_v61  ;;  %v2631_v54 = vmax.f32 %v2595_v27, 0.0 }
 0x248   : > { %v4160_v53 = vpop.f32.mrf.mxu0 }
 0x249   : > { %v2598_v35 = vadd.f32 %v4160_v53, %v2437_v39  ;;  %4201 = vmatprep.mubr.bf16.mxu1 %v2645_v8  ;;  %v2629_v13 = vmax.f32 %v2587_v43, 0.0 }
 0x24a   : > { %v2589_v29 = vpop.f32.mrf.mxu0  ;;  %4202 = vmatmul.mubr.bf16.gmra.mxu1 %v2646_v5 }
 0x24b   : > { %v2632_v55 = vmax.f32 %v2598_v35, 0.0  ;;  %v2590_v11 = vadd.f32 %v2589_v29, %v2429_v59 }
 0x24d   : > { %v2648_v33 = vpack.c.bf16 %v2632_v55, %v2631_v54  ;;  %v2630_v34 = vmax.f32 %v2590_v11, 0.0 }
 0x24f   : > { %v2647_v4 = vpack.c.bf16 %v2630_v34, %v2629_v13 }
 0x251   : > { %4205 = vmatprep.mubr.bf16.mxu1 %v2647_v4 }
 0x252   : > { %4206 = vmatmul.mubr.bf16.gmra.mxu1 %v2648_v33 }
 0x2da   : > { %v4179_v7 = vpop.f32.mrf.mxu1 }
 0x2db   : > { %v2763_v3 = vadd.f32 %v4179_v7, %v5900_v52 }
 0x2dc   : > { %v2754_v51 = vpop.f32.mrf.mxu1 }
 0x2dd   : > { %2883 = vst [vmem:[%s5905_s9 + $0x10] sm:$0xff] %v2763_v3  ;;  %v2755_v56 = vadd.f32 %v5900_v52, %v2754_v51 }
 0x2de   : > { %v4180_v18 = vpop.f32.mrf.mxu1 }
 0x2df   : > { %2881 = vst [vmem:[%s5905_s9] sm:$0xff] %v2755_v56  ;;  %v2766_v6 = vadd.f32 %v4180_v18, %v5900_v52 }
 0x2e0   : > { %v2757_v62 = vpop.f32.mrf.mxu1 }
 0x2e1   : > { %2884 = vst [vmem:[%s5905_s9 + $0x18] sm:$0xff] %v2766_v6  ;;  %v2758_v40 = vadd.f32 %v5900_v52, %v2757_v62 }
 0x2e2   : > { %v4183_v17 = vpop.f32.mrf.mxu1 }
 0x2e3   : > { %2882 = vst [vmem:[%s5905_s9 + $0x8] sm:$0xff] %v2758_v40  ;;  %v2779_v46 = vadd.f32 %v4183_v17, %v5900_v52 }
 0x2e4   : > { %v2770_v1 = vpop.f32.mrf.mxu1 }
 0x2e5   : > { %2887 = vst [vmem:[%s5905_s9 + $0x30] sm:$0xff] %v2779_v46  ;;  %v2771_v38 = vadd.f32 %v5900_v52, %v2770_v1 }
 0x2e6   : > { %v4184_v57 = vpop.f32.mrf.mxu1 }
 0x2e7   : > { %2885 = vst [vmem:[%s5905_s9 + $0x20] sm:$0xff] %v2771_v38  ;;  %v2782_v60 = vadd.f32 %v4184_v57, %v5900_v52 }
 0x2e8   : > { %v2773_v2 = vpop.f32.mrf.mxu1 }
 0x2e9   : > { %2888 = vst [vmem:[%s5905_s9 + $0x38] sm:$0xff] %v2782_v60  ;;  %v2774_v30 = vadd.f32 %v5900_v52, %v2773_v2 }
 0x2ea   : > { %v4187_v9 = vpop.f32.mrf.mxu1 }
 0x2eb   : > { %2886 = vst [vmem:[%s5905_s9 + $0x28] sm:$0xff] %v2774_v30  ;;  %v2795_v50 = vadd.f32 %v4187_v9, %v5900_v52 }
 0x2ec   : > { %v2786_v24 = vpop.f32.mrf.mxu1 }
 0x2ed   : > { %2891 = vst [vmem:[%s5905_s9 + $0x50] sm:$0xff] %v2795_v50  ;;  %v2787_v15 = vadd.f32 %v5900_v52, %v2786_v24 }
 0x2ee   : > { %v4188_v45 = vpop.f32.mrf.mxu1 }
 0x2ef   : > { %2889 = vst [vmem:[%s5905_s9 + $0x40] sm:$0xff] %v2787_v15  ;;  %v2798_v20 = vadd.f32 %v4188_v45, %v5900_v52 }
 0x2f0   : > { %v2789_v31 = vpop.f32.mrf.mxu1 }
 0x2f1   : > { %2892 = vst [vmem:[%s5905_s9 + $0x58] sm:$0xff] %v2798_v20  ;;  %v2790_v0 = vadd.f32 %v5900_v52, %v2789_v31 }
 0x2f2   : > { %v4191_v14 = vpop.f32.mrf.mxu1 }
 0x2f3   : > { %2890 = vst [vmem:[%s5905_s9 + $0x48] sm:$0xff] %v2790_v0  ;;  %v2811_v44 = vadd.f32 %v4191_v14, %v5900_v52 }
 0x2f4   : > { %v2802_v32 = vpop.f32.mrf.mxu1 }
 0x2f5   : > { %2895 = vst [vmem:[%s5905_s9 + $0x70] sm:$0xff] %v2811_v44  ;;  %v2803_v23 = vadd.f32 %v5900_v52, %v2802_v32 }
 0x2f6   : > { %v4192_v25 = vpop.f32.mrf.mxu1 }
 0x2f7   : > { %2893 = vst [vmem:[%s5905_s9 + $0x60] sm:$0xff] %v2803_v23  ;;  %v2814_v21 = vadd.f32 %v4192_v25, %v5900_v52 }
 0x2f8   : > { %v2805_v16 = vpop.f32.mrf.mxu1 }
 0x2f9   : > { %2896 = vst [vmem:[%s5905_s9 + $0x78] sm:$0xff] %v2814_v21  ;;  %v2806_v36 = vadd.f32 %v5900_v52, %v2805_v16 }
 0x2fa   : > { %v4195_v10 = vpop.f32.mrf.mxu1 }
 0x2fb   : > { %2894 = vst [vmem:[%s5905_s9 + $0x68] sm:$0xff] %v2806_v36  ;;  %v2827_v58 = vadd.f32 %v4195_v10, %v5900_v52 }
 0x2fc   : > { %v2818_v41 = vpop.f32.mrf.mxu1 }
 0x2fd   : > { %2899 = vst [vmem:[%s5905_s9 + $0x90] sm:$0xff] %v2827_v58  ;;  %v2819_v48 = vadd.f32 %v5900_v52, %v2818_v41 }
 0x2fe   : > { %v4196_v12 = vpop.f32.mrf.mxu1 }
 0x2ff   : > { %2897 = vst [vmem:[%s5905_s9 + $0x80] sm:$0xff] %v2819_v48  ;;  %v2830_v26 = vadd.f32 %v4196_v12, %v5900_v52 }
 0x300   : > { %v2821_v37 = vpop.f32.mrf.mxu1 }
 0x301   : > { %2900 = vst [vmem:[%s5905_s9 + $0x98] sm:$0xff] %v2830_v26  ;;  %v2822_v63 = vadd.f32 %v5900_v52, %v2821_v37 }
 0x302   : > { %v4199_v47 = vpop.f32.mrf.mxu1 }
 0x303   : > { %2898 = vst [vmem:[%s5905_s9 + $0x88] sm:$0xff] %v2822_v63  ;;  %v2843_v22 = vadd.f32 %v4199_v47, %v5900_v52 }
 0x304   : > { %v2834_v5 = vpop.f32.mrf.mxu1 }
 0x305   : > { %2903 = vst [vmem:[%s5905_s9 + $0xb0] sm:$0xff] %v2843_v22  ;;  %v2835_v28 = vadd.f32 %v5900_v52, %v2834_v5 }
 0x306   : > { %v4200_v42 = vpop.f32.mrf.mxu1 }
 0x307   : > { %2901 = vst [vmem:[%s5905_s9 + $0xa0] sm:$0xff] %v2835_v28  ;;  %v2846_v49 = vadd.f32 %v4200_v42, %v5900_v52 }
 0x308   : > { %v2837_v8 = vpop.f32.mrf.mxu1 }
 0x309   : > { %2904 = vst [vmem:[%s5905_s9 + $0xb8] sm:$0xff] %v2846_v49  ;;  %v2838_v27 = vadd.f32 %v5900_v52, %v2837_v8 }
 0x30a   : > { %v4203_v61 = vpop.f32.mrf.mxu1 }
 0x30b   : > { %2902 = vst [vmem:[%s5905_s9 + $0xa8] sm:$0xff] %v2838_v27  ;;  %v2859_v39 = vadd.f32 %v4203_v61, %v5900_v52 }
 0x30c   : > { %v2850_v53 = vpop.f32.mrf.mxu1 }
 0x30d   : > { %2907 = vst [vmem:[%s5905_s9 + $0xd0] sm:$0xff] %v2859_v39  ;;  %v2851_v43 = vadd.f32 %v5900_v52, %v2850_v53 }
 0x30e   : > { %v4204_v35 = vpop.f32.mrf.mxu1 }
 0x30f   : > { %2905 = vst [vmem:[%s5905_s9 + $0xc0] sm:$0xff] %v2851_v43  ;;  %v2862_v19 = vadd.f32 %v4204_v35, %v5900_v52 }
 0x310   : > { %v2853_v59 = vpop.f32.mrf.mxu1 }
 0x311   : > { %2908 = vst [vmem:[%s5905_s9 + $0xd8] sm:$0xff] %v2862_v19  ;;  %v2854_v29 = vadd.f32 %v5900_v52, %v2853_v59 }
 0x312   : > { %v4207_v54 = vpop.f32.mrf.mxu1 }
 0x313   : > { %2906 = vst [vmem:[%s5905_s9 + $0xc8] sm:$0xff] %v2854_v29  ;;  %v2875_v55 = vadd.f32 %v4207_v54, %v5900_v52 }
 0x314   : > { %v2866_v11 = vpop.f32.mrf.mxu1 }
 0x315   : > { %2911 = vst [vmem:[%s5905_s9 + $0xf0] sm:$0xff] %v2875_v55  ;;  %v2867_v13 = vadd.f32 %v5900_v52, %v2866_v11 }
 0x316   : > { %v4208_v33 = vpop.f32.mrf.mxu1 }
 0x317   : > { %2909 = vst [vmem:[%s5905_s9 + $0xe0] sm:$0xff] %v2867_v13  ;;  %v2878_v34 = vadd.f32 %v4208_v33, %v5900_v52 }
 0x318   : > { %v2869_v4 = vpop.f32.mrf.mxu1 }
 0x319   : > { %2912 = vst [vmem:[%s5905_s9 + $0xf8] sm:$0xff] %v2878_v34  ;;  %v2870_v7 = vadd.f32 %v5900_v52, %v2869_v4 }
 0x31b   : > { %2910 = vst [vmem:[%s5905_s9 + $0xe8] sm:$0xff] %v2870_v7 }
 0x31c PF: > { %s19_s24 = sadd.s32 1, %s4442_s24   ;;  %s6326_s1 = smov %s4438_s2 }
 0x31d   : > { %p16_p4 = scmp.ge.s32.totalorder %s19_s24, 4   ;;  %s6327_s2 = smov %s6329_s26 }
 0x31f   :  { %18 = sbr.rel (!%p16_p4) target bundleno = 3 (0x3), region = 93 }
 0x324   :  { %2945 = vsyncpa [#allocation3], 1 }
 0x325   :  { %2947 = vsyncpa [#allocation3 + $0x1], 1 }
 0x326   :  { %2948 = vsyncpa [#allocation5], 1 }

</bundles_post_ra>
